<compile_context>
chip_gen: v7x
topology: tpu7x:2x2x1
jax: 0.10.0
libtpu: 0.0.40
codegen_flags: <defaults>
</compile_context>

<pallas_src>
import jax
import jax.numpy as jnp
import numpy as np
from jax.experimental import pallas as pl
from jax.experimental.pallas import tpu as pltpu

N_TAPS = 16  # 4x4 conv kernel taps


# ----------------------------------------------------------------------------
# In-kernel building blocks
# ----------------------------------------------------------------------------
def _bn_lrelu(y, g, b, eps=1e-5):
    """BatchNorm (training-mode batch stats, biased var) + LeakyReLU(0.2).

    Rows of y are ordered (b, h, w), so per-column statistics equal
    nn.BatchNorm2d's per-channel statistics over (N, H, W).
    """
    mean = jnp.mean(y, axis=0, keepdims=True)
    var = jnp.mean(jnp.square(y - mean), axis=0, keepdims=True)
    z = (y - mean) * jax.lax.rsqrt(var + eps) * g + b
    return jnp.where(z > 0, z, 0.2 * z)


def _conv_taps(sel_ref, a_prev, w_ref):
    """4x4 / stride-2 / pad-1 conv as 16 per-tap MXU matmuls, fully in VMEM.

    sel_ref: (16*M_out, M_in) stacked 0/1 spatial-gather matrices (rows for
             padding taps are all zero).  w_ref: (16*C_in, C_out), row order
             (kh, kw, cin).  a_prev: (M_in, C_in), rows ordered (b, h, w).
    """
    m_out = sel_ref.shape[0] // N_TAPS
    c_in = w_ref.shape[0] // N_TAPS
    c_out = w_ref.shape[1]
    y = jnp.zeros((m_out, c_out), jnp.float32)
    for t in range(N_TAPS):
        gathered = jnp.dot(sel_ref[pl.ds(t * m_out, m_out), :], a_prev,
                           preferred_element_type=jnp.float32)   # (M_out, C_in)
        y = y + jnp.dot(gathered, w_ref[pl.ds(t * c_in, c_in), :],
                        preferred_element_type=jnp.float32)      # tap contribution
    return y


def _discriminator_kernel(p1_ref, w1_ref,
                          sel2_ref, w2_ref, g2_ref, b2_ref,
                          sel3_ref, w3_ref, g3_ref, b3_ref,
                          w4_ref, o_ref):
    # block 1: conv + LeakyReLU (patches pre-im2col'd outside; K unpadded)
    a1 = jnp.dot(p1_ref[...], w1_ref[...], preferred_element_type=jnp.float32)
    a1 = jnp.where(a1 > 0, a1, 0.2 * a1)                         # (M1, C1)

    # block 2: conv (in-kernel im2col via selection matmuls) + BN + LeakyReLU
    a2 = _bn_lrelu(_conv_taps(sel2_ref, a1, w2_ref), g2_ref[...], b2_ref[...])

    # block 3: conv (in-kernel im2col via selection matmuls) + BN + LeakyReLU
    a3 = _bn_lrelu(_conv_taps(sel3_ref, a2, w3_ref), g3_ref[...], b3_ref[...])

    # block 4: 4x4/stride-2/pad-1 conv on a 2x2 map -> only its central 2x2
    # taps touch data, i.e. elementwise multiply with row-aligned weights plus
    # a per-batch reduction (no O(B^2) pooling matmul), then sigmoid.
    prod = a3 * w4_ref[...]                                      # (B*4, C3)
    batch = o_ref.shape[0]
    for b in range(batch):
        logit = jnp.sum(prod[4 * b:4 * b + 4, :], keepdims=True)  # (1, 1)
        o_ref[pl.ds(b, 1), :] = 1.0 / (1.0 + jnp.exp(-logit))


# ----------------------------------------------------------------------------
# JAX glue: channels-last im2col for layer 1 only (operates on the raw input)
# ----------------------------------------------------------------------------
def _im2col_nhwc(x, k=4, stride=2, pad=1):
    """x: (B, H, W, C) -> patches (B*Ho*Wo, k*k*C); rows (b,ho,wo), K (kh,kw,c)."""
    B, H, W, C = x.shape
    xp = jnp.pad(x, ((0, 0), (pad, pad), (pad, pad), (0, 0)))
    ho = (H + 2 * pad - k) // stride + 1
    wo = (W + 2 * pad - k) // stride + 1
    parts = [xp[:, kh:kh + stride * ho:stride, kw:kw + stride * wo:stride, :]
             for kh in range(k) for kw in range(k)]
    patches = jnp.concatenate(parts, axis=-1)                    # (B, ho, wo, k*k*C)
    return patches.reshape(B * ho * wo, k * k * C)


# ----------------------------------------------------------------------------
# Host-side parameter preparation (run once, outside jit)
# ----------------------------------------------------------------------------
def _conv_selection(batch, h, w, k=4, stride=2, pad=1):
    """Stacked (16*M_out, M_in) 0/1 spatial-gather matrices for a 4x4/2/1 conv."""
    ho = (h + 2 * pad - k) // stride + 1
    wo = (w + 2 * pad - k) // stride + 1
    m_in, m_out = batch * h * w, batch * ho * wo
    sel = np.zeros((k * k, m_out, m_in), np.float32)
    for b in range(batch):
        for oy in range(ho):
            for ox in range(wo):
                m = (b * ho + oy) * wo + ox
                for kh in range(k):
                    for kw in range(k):
                        iy, ix = stride * oy - pad + kh, stride * ox - pad + kw
                        if 0 <= iy < h and 0 <= ix < w:
                            sel[kh * k + kw, m, (b * h + iy) * w + ix] = 1.0
    return jnp.asarray(sel.reshape(k * k * m_out, m_in))


def prepare_params(params, batch, in_hw=16):
    """OIHW -> (kh*kw*cin, cout) weights, spatial-gather matrices, head weights."""
    def to_kc(wt):  # (Cout, Cin, kh, kw) -> (kh*kw*Cin, Cout)
        return jnp.transpose(wt, (2, 3, 1, 0)).reshape(-1, wt.shape[0])

    h1, h2, h3 = in_hw // 2, in_hw // 4, in_hw // 8
    assert h3 == 2, "fused block-4 head assumes a 2x2 block-3 output (16x16 input)"
    c3 = params["w3"].shape[0]

    # block 4: only the central 2x2 taps of the 4x4 kernel touch the padded 2x2
    # input; w4_rows[b*4 + h*2 + w, c] = w4[0, c, h+1, w+1].
    w4 = jnp.transpose(params["w4"][0, :, 1:3, 1:3], (1, 2, 0)).reshape(4, c3)
    w4_rows = jnp.tile(w4, (batch, 1))                           # (B*4, C3)

    return {
        "w1t": to_kc(params["w1"]),                  # (16*nc,   ndf)  -- K unpadded
        "w2t": to_kc(params["w2"]),                  # (16*ndf,  2ndf)
        "w3t": to_kc(params["w3"]),                  # (16*2ndf, 4ndf)
        "g2": params["g2"].reshape(1, -1), "b2": params["b2"].reshape(1, -1),
        "g3": params["g3"].reshape(1, -1), "b3": params["b3"].reshape(1, -1),
        "sel2": _conv_selection(batch, h1, h1),      # (16*M2, M1)
        "sel3": _conv_selection(batch, h2, h2),      # (16*M3, M2)
        "w4r": w4_rows,
    }


# ----------------------------------------------------------------------------
# Forward pass (one pallas_call)
# ----------------------------------------------------------------------------
def discriminator_forward(x, prep):
    """x: (B, C, H, W) NCHW like the PyTorch module; returns (B, 1)."""
    B = x.shape[0]
    xh = jnp.transpose(x, (0, 2, 3, 1))              # single NCHW -> NHWC change
    p1 = _im2col_nhwc(xh)                            # (B*H1*W1, 16*nc)

    args = (p1, prep["w1t"],
            prep["sel2"], prep["w2t"], prep["g2"], prep["b2"],
            prep["sel3"], prep["w3t"], prep["g3"], prep["b3"],
            prep["w4r"])
    return pl.pallas_call(
        _discriminator_kernel,
        out_shape=jax.ShapeDtypeStruct((B, 1), jnp.float32),
        in_specs=[pl.BlockSpec(memory_space=pltpu.MemorySpace.VMEM)] * len(args),
        out_specs=pl.BlockSpec(memory_space=pltpu.MemorySpace.VMEM),
    )(*args)                                         # == nn.Flatten() of (B,1,1,1)


# ----------------------------------------------------------------------------
# Pure-JAX reference (correctness check only)
# ----------------------------------------------------------------------------
def _ref_forward(x, params):
    def conv(x, w):
        return jax.lax.conv_general_dilated(
            x, w, (2, 2), ((1, 1), (1, 1)),
            dimension_numbers=("NCHW", "OIHW", "NCHW"))

    def bn(x, g, b):
        m = jnp.mean(x, axis=(0, 2, 3), keepdims=True)
        v = jnp.mean(jnp.square(x - m), axis=(0, 2, 3), keepdims=True)
        return (x - m) * jax.lax.rsqrt(v + 1e-5) * g[None, :, None, None] \
               + b[None, :, None, None]

    lrelu = lambda z: jnp.where(z > 0, z, 0.2 * z)
    x = lrelu(conv(x, params["w1"]))
    x = lrelu(bn(conv(x, params["w2"]), params["g2"], params["b2"]))
    x = lrelu(bn(conv(x, params["w3"]), params["g3"], params["b3"]))
    x = jax.nn.sigmoid(conv(x, params["w4"]))
    return x.reshape(x.shape[0], -1)


# ----------------------------------------------------------------------------
# Main
# ----------------------------------------------------------------------------
if __name__ == "__main__":
    nc, ndf = 1, 16          # small synthetic config (PyTorch default ndf=64)
    B, H, W = 2, 16, 16      # 16 -> 8 -> 4 -> 2 -> 1 with (4, 2, 1) convs

    key = jax.random.PRNGKey(0)
    k_x, k1, k2, k3, k4 = jax.random.split(key, 5)

    x = jax.random.normal(k_x, (B, nc, H, W), dtype=jnp.float32)

    params = {
        "w1": 0.02 * jax.random.normal(k1, (ndf, nc, 4, 4), jnp.float32),
        "w2": 0.02 * jax.random.normal(k2, (ndf * 2, ndf, 4, 4), jnp.float32),
        "w3": 0.02 * jax.random.normal(k3, (ndf * 4, ndf * 2, 4, 4), jnp.float32),
        "w4": 0.02 * jax.random.normal(k4, (1, ndf * 4, 4, 4), jnp.float32),
        "g2": jnp.ones((ndf * 2,), jnp.float32),   # BatchNorm2d default affine init
        "b2": jnp.zeros((ndf * 2,), jnp.float32),
        "g3": jnp.ones((ndf * 4,), jnp.float32),
        "b3": jnp.zeros((ndf * 4,), jnp.float32),
    }

    prep = prepare_params(params, batch=B, in_hw=H)  # host-side, outside jit

    fwd = jax.jit(discriminator_forward)
    out = jax.block_until_ready(fwd(x, prep))

    ref = _ref_forward(x, params)
    assert out.shape == (B, 1), out.shape
    assert jnp.allclose(out, ref, atol=1e-3, rtol=1e-3), (out, ref)

    print("KERNEL_OK")
</pallas_src>

<mosaic_0001>
module attributes {stable_mosaic.version = 11 : i64} {
  func.func @_discriminator_kernel(%arg0: memref<128x16xf32, #tpu.memory_space<vmem>>, %arg1: memref<16x16xf32, #tpu.memory_space<vmem>>, %arg2: memref<512x128xf32, #tpu.memory_space<vmem>>, %arg3: memref<256x32xf32, #tpu.memory_space<vmem>>, %arg4: memref<1x32xf32, #tpu.memory_space<vmem>>, %arg5: memref<1x32xf32, #tpu.memory_space<vmem>>, %arg6: memref<128x32xf32, #tpu.memory_space<vmem>>, %arg7: memref<512x64xf32, #tpu.memory_space<vmem>>, %arg8: memref<1x64xf32, #tpu.memory_space<vmem>>, %arg9: memref<1x64xf32, #tpu.memory_space<vmem>>, %arg10: memref<8x64xf32, #tpu.memory_space<vmem>>, %arg11: memref<2x1xf32, #tpu.memory_space<vmem>>) attributes {dimension_semantics = [], scalar_prefetch = 0 : i64, scratch_operands = 0 : i64, tpu.core_type = #tpu.core_type<tc>} {
    %c0 = arith.constant 0 : index
    %c0_0 = arith.constant 0 : index
    %0 = vector.load %arg0[%c0, %c0_0] : memref<128x16xf32, #tpu.memory_space<vmem>>, vector<128x16xf32>
    %c0_1 = arith.constant 0 : index
    %c0_2 = arith.constant 0 : index
    %1 = vector.load %arg1[%c0_1, %c0_2] : memref<16x16xf32, #tpu.memory_space<vmem>>, vector<16x16xf32>
    %cst = arith.constant dense<0.000000e+00> : vector<128x16xf32>
    %2 = tpu.matmul %0, %1, %cst {dimension_numbers = #tpu.dot_dimension_numbers<[1], [0], [0], [1], [0, 0, 1, 1], [], []>} : vector<128x16xf32>, vector<16x16xf32>, vector<128x16xf32> -> vector<128x16xf32>
    %cst_3 = arith.constant 0.000000e+00 : f32
    %3 = vector.broadcast %cst_3 : f32 to vector<128x16xf32>
    %4 = arith.cmpf ogt, %2, %3 : vector<128x16xf32>
    %cst_4 = arith.constant 2.000000e-01 : f32
    %5 = vector.broadcast %cst_4 : f32 to vector<128x16xf32>
    %6 = arith.mulf %5, %2 : vector<128x16xf32>
    %7 = arith.select %4, %2, %6 : vector<128x16xi1>, vector<128x16xf32>
    %cst_5 = arith.constant 0.000000e+00 : f32
    %8 = vector.broadcast %cst_5 : f32 to vector<32x32xf32>
    %c0_6 = arith.constant 0 : index
    %c0_7 = arith.constant 0 : index
    %9 = vector.load %arg2[%c0_6, %c0_7] : memref<512x128xf32, #tpu.memory_space<vmem>>, vector<32x128xf32>
    %cst_8 = arith.constant dense<0.000000e+00> : vector<32x16xf32>
    %10 = tpu.matmul %9, %7, %cst_8 {dimension_numbers = #tpu.dot_dimension_numbers<[1], [0], [0], [1], [0, 0, 1, 1], [], []>} : vector<32x128xf32>, vector<128x16xf32>, vector<32x16xf32> -> vector<32x16xf32>
    %c0_9 = arith.constant 0 : index
    %c0_10 = arith.constant 0 : index
    %11 = vector.load %arg3[%c0_9, %c0_10] : memref<256x32xf32, #tpu.memory_space<vmem>>, vector<16x32xf32>
    %cst_11 = arith.constant dense<0.000000e+00> : vector<32x32xf32>
    %12 = tpu.matmul %10, %11, %cst_11 {dimension_numbers = #tpu.dot_dimension_numbers<[1], [0], [0], [1], [0, 0, 1, 1], [], []>} : vector<32x16xf32>, vector<16x32xf32>, vector<32x32xf32> -> vector<32x32xf32>
    %13 = arith.addf %8, %12 : vector<32x32xf32>
    %c32 = arith.constant 32 : index
    %c0_12 = arith.constant 0 : index
    %14 = vector.load %arg2[%c32, %c0_12] : memref<512x128xf32, #tpu.memory_space<vmem>>, vector<32x128xf32>
    %cst_13 = arith.constant dense<0.000000e+00> : vector<32x16xf32>
    %15 = tpu.matmul %14, %7, %cst_13 {dimension_numbers = #tpu.dot_dimension_numbers<[1], [0], [0], [1], [0, 0, 1, 1], [], []>} : vector<32x128xf32>, vector<128x16xf32>, vector<32x16xf32> -> vector<32x16xf32>
    %c16 = arith.constant 16 : index
    %c0_14 = arith.constant 0 : index
    %16 = vector.load %arg3[%c16, %c0_14] : memref<256x32xf32, #tpu.memory_space<vmem>>, vector<16x32xf32>
    %cst_15 = arith.constant dense<0.000000e+00> : vector<32x32xf32>
    %17 = tpu.matmul %15, %16, %cst_15 {dimension_numbers = #tpu.dot_dimension_numbers<[1], [0], [0], [1], [0, 0, 1, 1], [], []>} : vector<32x16xf32>, vector<16x32xf32>, vector<32x32xf32> -> vector<32x32xf32>
    %18 = arith.addf %13, %17 : vector<32x32xf32>
    %c64 = arith.constant 64 : index
    %c0_16 = arith.constant 0 : index
    %19 = vector.load %arg2[%c64, %c0_16] : memref<512x128xf32, #tpu.memory_space<vmem>>, vector<32x128xf32>
    %cst_17 = arith.constant dense<0.000000e+00> : vector<32x16xf32>
    %20 = tpu.matmul %19, %7, %cst_17 {dimension_numbers = #tpu.dot_dimension_numbers<[1], [0], [0], [1], [0, 0, 1, 1], [], []>} : vector<32x128xf32>, vector<128x16xf32>, vector<32x16xf32> -> vector<32x16xf32>
    %c32_18 = arith.constant 32 : index
    %c0_19 = arith.constant 0 : index
    %21 = vector.load %arg3[%c32_18, %c0_19] : memref<256x32xf32, #tpu.memory_space<vmem>>, vector<16x32xf32>
    %cst_20 = arith.constant dense<0.000000e+00> : vector<32x32xf32>
    %22 = tpu.matmul %20, %21, %cst_20 {dimension_numbers = #tpu.dot_dimension_numbers<[1], [0], [0], [1], [0, 0, 1, 1], [], []>} : vector<32x16xf32>, vector<16x32xf32>, vector<32x32xf32> -> vector<32x32xf32>
    %23 = arith.addf %18, %22 : vector<32x32xf32>
    %c96 = arith.constant 96 : index
    %c0_21 = arith.constant 0 : index
    %24 = vector.load %arg2[%c96, %c0_21] : memref<512x128xf32, #tpu.memory_space<vmem>>, vector<32x128xf32>
    %cst_22 = arith.constant dense<0.000000e+00> : vector<32x16xf32>
    %25 = tpu.matmul %24, %7, %cst_22 {dimension_numbers = #tpu.dot_dimension_numbers<[1], [0], [0], [1], [0, 0, 1, 1], [], []>} : vector<32x128xf32>, vector<128x16xf32>, vector<32x16xf32> -> vector<32x16xf32>
    %c48 = arith.constant 48 : index
    %c0_23 = arith.constant 0 : index
    %26 = vector.load %arg3[%c48, %c0_23] : memref<256x32xf32, #tpu.memory_space<vmem>>, vector<16x32xf32>
    %cst_24 = arith.constant dense<0.000000e+00> : vector<32x32xf32>
    %27 = tpu.matmul %25, %26, %cst_24 {dimension_numbers = #tpu.dot_dimension_numbers<[1], [0], [0], [1], [0, 0, 1, 1], [], []>} : vector<32x16xf32>, vector<16x32xf32>, vector<32x32xf32> -> vector<32x32xf32>
    %28 = arith.addf %23, %27 : vector<32x32xf32>
    %c128 = arith.constant 128 : index
    %c0_25 = arith.constant 0 : index
    %29 = vector.load %arg2[%c128, %c0_25] : memref<512x128xf32, #tpu.memory_space<vmem>>, vector<32x128xf32>
    %cst_26 = arith.constant dense<0.000000e+00> : vector<32x16xf32>
    %30 = tpu.matmul %29, %7, %cst_26 {dimension_numbers = #tpu.dot_dimension_numbers<[1], [0], [0], [1], [0, 0, 1, 1], [], []>} : vector<32x128xf32>, vector<128x16xf32>, vector<32x16xf32> -> vector<32x16xf32>
    %c64_27 = arith.constant 64 : index
    %c0_28 = arith.constant 0 : index
    %31 = vector.load %arg3[%c64_27, %c0_28] : memref<256x32xf32, #tpu.memory_space<vmem>>, vector<16x32xf32>
    %cst_29 = arith.constant dense<0.000000e+00> : vector<32x32xf32>
    %32 = tpu.matmul %30, %31, %cst_29 {dimension_numbers = #tpu.dot_dimension_numbers<[1], [0], [0], [1], [0, 0, 1, 1], [], []>} : vector<32x16xf32>, vector<16x32xf32>, vector<32x32xf32> -> vector<32x32xf32>
    %33 = arith.addf %28, %32 : vector<32x32xf32>
    %c160 = arith.constant 160 : index
    %c0_30 = arith.constant 0 : index
    %34 = vector.load %arg2[%c160, %c0_30] : memref<512x128xf32, #tpu.memory_space<vmem>>, vector<32x128xf32>
    %cst_31 = arith.constant dense<0.000000e+00> : vector<32x16xf32>
    %35 = tpu.matmul %34, %7, %cst_31 {dimension_numbers = #tpu.dot_dimension_numbers<[1], [0], [0], [1], [0, 0, 1, 1], [], []>} : vector<32x128xf32>, vector<128x16xf32>, vector<32x16xf32> -> vector<32x16xf32>
    %c80 = arith.constant 80 : index
    %c0_32 = arith.constant 0 : index
    %36 = vector.load %arg3[%c80, %c0_32] : memref<256x32xf32, #tpu.memory_space<vmem>>, vector<16x32xf32>
    %cst_33 = arith.constant dense<0.000000e+00> : vector<32x32xf32>
    %37 = tpu.matmul %35, %36, %cst_33 {dimension_numbers = #tpu.dot_dimension_numbers<[1], [0], [0], [1], [0, 0, 1, 1], [], []>} : vector<32x16xf32>, vector<16x32xf32>, vector<32x32xf32> -> vector<32x32xf32>
    %38 = arith.addf %33, %37 : vector<32x32xf32>
    %c192 = arith.constant 192 : index
    %c0_34 = arith.constant 0 : index
    %39 = vector.load %arg2[%c192, %c0_34] : memref<512x128xf32, #tpu.memory_space<vmem>>, vector<32x128xf32>
    %cst_35 = arith.constant dense<0.000000e+00> : vector<32x16xf32>
    %40 = tpu.matmul %39, %7, %cst_35 {dimension_numbers = #tpu.dot_dimension_numbers<[1], [0], [0], [1], [0, 0, 1, 1], [], []>} : vector<32x128xf32>, vector<128x16xf32>, vector<32x16xf32> -> vector<32x16xf32>
    %c96_36 = arith.constant 96 : index
    %c0_37 = arith.constant 0 : index
    %41 = vector.load %arg3[%c96_36, %c0_37] : memref<256x32xf32, #tpu.memory_space<vmem>>, vector<16x32xf32>
    %cst_38 = arith.constant dense<0.000000e+00> : vector<32x32xf32>
    %42 = tpu.matmul %40, %41, %cst_38 {dimension_numbers = #tpu.dot_dimension_numbers<[1], [0], [0], [1], [0, 0, 1, 1], [], []>} : vector<32x16xf32>, vector<16x32xf32>, vector<32x32xf32> -> vector<32x32xf32>
    %43 = arith.addf %38, %42 : vector<32x32xf32>
    %c224 = arith.constant 224 : index
    %c0_39 = arith.constant 0 : index
    %44 = vector.load %arg2[%c224, %c0_39] : memref<512x128xf32, #tpu.memory_space<vmem>>, vector<32x128xf32>
    %cst_40 = arith.constant dense<0.000000e+00> : vector<32x16xf32>
    %45 = tpu.matmul %44, %7, %cst_40 {dimension_numbers = #tpu.dot_dimension_numbers<[1], [0], [0], [1], [0, 0, 1, 1], [], []>} : vector<32x128xf32>, vector<128x16xf32>, vector<32x16xf32> -> vector<32x16xf32>
    %c112 = arith.constant 112 : index
    %c0_41 = arith.constant 0 : index
    %46 = vector.load %arg3[%c112, %c0_41] : memref<256x32xf32, #tpu.memory_space<vmem>>, vector<16x32xf32>
    %cst_42 = arith.constant dense<0.000000e+00> : vector<32x32xf32>
    %47 = tpu.matmul %45, %46, %cst_42 {dimension_numbers = #tpu.dot_dimension_numbers<[1], [0], [0], [1], [0, 0, 1, 1], [], []>} : vector<32x16xf32>, vector<16x32xf32>, vector<32x32xf32> -> vector<32x32xf32>
    %48 = arith.addf %43, %47 : vector<32x32xf32>
    %c256 = arith.constant 256 : index
    %c0_43 = arith.constant 0 : index
    %49 = vector.load %arg2[%c256, %c0_43] : memref<512x128xf32, #tpu.memory_space<vmem>>, vector<32x128xf32>
    %cst_44 = arith.constant dense<0.000000e+00> : vector<32x16xf32>
    %50 = tpu.matmul %49, %7, %cst_44 {dimension_numbers = #tpu.dot_dimension_numbers<[1], [0], [0], [1], [0, 0, 1, 1], [], []>} : vector<32x128xf32>, vector<128x16xf32>, vector<32x16xf32> -> vector<32x16xf32>
    %c128_45 = arith.constant 128 : index
    %c0_46 = arith.constant 0 : index
    %51 = vector.load %arg3[%c128_45, %c0_46] : memref<256x32xf32, #tpu.memory_space<vmem>>, vector<16x32xf32>
    %cst_47 = arith.constant dense<0.000000e+00> : vector<32x32xf32>
    %52 = tpu.matmul %50, %51, %cst_47 {dimension_numbers = #tpu.dot_dimension_numbers<[1], [0], [0], [1], [0, 0, 1, 1], [], []>} : vector<32x16xf32>, vector<16x32xf32>, vector<32x32xf32> -> vector<32x32xf32>
    %53 = arith.addf %48, %52 : vector<32x32xf32>
    %c288 = arith.constant 288 : index
    %c0_48 = arith.constant 0 : index
    %54 = vector.load %arg2[%c288, %c0_48] : memref<512x128xf32, #tpu.memory_space<vmem>>, vector<32x128xf32>
    %cst_49 = arith.constant dense<0.000000e+00> : vector<32x16xf32>
    %55 = tpu.matmul %54, %7, %cst_49 {dimension_numbers = #tpu.dot_dimension_numbers<[1], [0], [0], [1], [0, 0, 1, 1], [], []>} : vector<32x128xf32>, vector<128x16xf32>, vector<32x16xf32> -> vector<32x16xf32>
    %c144 = arith.constant 144 : index
    %c0_50 = arith.constant 0 : index
    %56 = vector.load %arg3[%c144, %c0_50] : memref<256x32xf32, #tpu.memory_space<vmem>>, vector<16x32xf32>
    %cst_51 = arith.constant dense<0.000000e+00> : vector<32x32xf32>
    %57 = tpu.matmul %55, %56, %cst_51 {dimension_numbers = #tpu.dot_dimension_numbers<[1], [0], [0], [1], [0, 0, 1, 1], [], []>} : vector<32x16xf32>, vector<16x32xf32>, vector<32x32xf32> -> vector<32x32xf32>
    %58 = arith.addf %53, %57 : vector<32x32xf32>
    %c320 = arith.constant 320 : index
    %c0_52 = arith.constant 0 : index
    %59 = vector.load %arg2[%c320, %c0_52] : memref<512x128xf32, #tpu.memory_space<vmem>>, vector<32x128xf32>
    %cst_53 = arith.constant dense<0.000000e+00> : vector<32x16xf32>
    %60 = tpu.matmul %59, %7, %cst_53 {dimension_numbers = #tpu.dot_dimension_numbers<[1], [0], [0], [1], [0, 0, 1, 1], [], []>} : vector<32x128xf32>, vector<128x16xf32>, vector<32x16xf32> -> vector<32x16xf32>
    %c160_54 = arith.constant 160 : index
    %c0_55 = arith.constant 0 : index
    %61 = vector.load %arg3[%c160_54, %c0_55] : memref<256x32xf32, #tpu.memory_space<vmem>>, vector<16x32xf32>
    %cst_56 = arith.constant dense<0.000000e+00> : vector<32x32xf32>
    %62 = tpu.matmul %60, %61, %cst_56 {dimension_numbers = #tpu.dot_dimension_numbers<[1], [0], [0], [1], [0, 0, 1, 1], [], []>} : vector<32x16xf32>, vector<16x32xf32>, vector<32x32xf32> -> vector<32x32xf32>
    %63 = arith.addf %58, %62 : vector<32x32xf32>
    %c352 = arith.constant 352 : index
    %c0_57 = arith.constant 0 : index
    %64 = vector.load %arg2[%c352, %c0_57] : memref<512x128xf32, #tpu.memory_space<vmem>>, vector<32x128xf32>
    %cst_58 = arith.constant dense<0.000000e+00> : vector<32x16xf32>
    %65 = tpu.matmul %64, %7, %cst_58 {dimension_numbers = #tpu.dot_dimension_numbers<[1], [0], [0], [1], [0, 0, 1, 1], [], []>} : vector<32x128xf32>, vector<128x16xf32>, vector<32x16xf32> -> vector<32x16xf32>
    %c176 = arith.constant 176 : index
    %c0_59 = arith.constant 0 : index
    %66 = vector.load %arg3[%c176, %c0_59] : memref<256x32xf32, #tpu.memory_space<vmem>>, vector<16x32xf32>
    %cst_60 = arith.constant dense<0.000000e+00> : vector<32x32xf32>
    %67 = tpu.matmul %65, %66, %cst_60 {dimension_numbers = #tpu.dot_dimension_numbers<[1], [0], [0], [1], [0, 0, 1, 1], [], []>} : vector<32x16xf32>, vector<16x32xf32>, vector<32x32xf32> -> vector<32x32xf32>
    %68 = arith.addf %63, %67 : vector<32x32xf32>
    %c384 = arith.constant 384 : index
    %c0_61 = arith.constant 0 : index
    %69 = vector.load %arg2[%c384, %c0_61] : memref<512x128xf32, #tpu.memory_space<vmem>>, vector<32x128xf32>
    %cst_62 = arith.constant dense<0.000000e+00> : vector<32x16xf32>
    %70 = tpu.matmul %69, %7, %cst_62 {dimension_numbers = #tpu.dot_dimension_numbers<[1], [0], [0], [1], [0, 0, 1, 1], [], []>} : vector<32x128xf32>, vector<128x16xf32>, vector<32x16xf32> -> vector<32x16xf32>
    %c192_63 = arith.constant 192 : index
    %c0_64 = arith.constant 0 : index
    %71 = vector.load %arg3[%c192_63, %c0_64] : memref<256x32xf32, #tpu.memory_space<vmem>>, vector<16x32xf32>
    %cst_65 = arith.constant dense<0.000000e+00> : vector<32x32xf32>
    %72 = tpu.matmul %70, %71, %cst_65 {dimension_numbers = #tpu.dot_dimension_numbers<[1], [0], [0], [1], [0, 0, 1, 1], [], []>} : vector<32x16xf32>, vector<16x32xf32>, vector<32x32xf32> -> vector<32x32xf32>
    %73 = arith.addf %68, %72 : vector<32x32xf32>
    %c416 = arith.constant 416 : index
    %c0_66 = arith.constant 0 : index
    %74 = vector.load %arg2[%c416, %c0_66] : memref<512x128xf32, #tpu.memory_space<vmem>>, vector<32x128xf32>
    %cst_67 = arith.constant dense<0.000000e+00> : vector<32x16xf32>
    %75 = tpu.matmul %74, %7, %cst_67 {dimension_numbers = #tpu.dot_dimension_numbers<[1], [0], [0], [1], [0, 0, 1, 1], [], []>} : vector<32x128xf32>, vector<128x16xf32>, vector<32x16xf32> -> vector<32x16xf32>
    %c208 = arith.constant 208 : index
    %c0_68 = arith.constant 0 : index
    %76 = vector.load %arg3[%c208, %c0_68] : memref<256x32xf32, #tpu.memory_space<vmem>>, vector<16x32xf32>
    %cst_69 = arith.constant dense<0.000000e+00> : vector<32x32xf32>
    %77 = tpu.matmul %75, %76, %cst_69 {dimension_numbers = #tpu.dot_dimension_numbers<[1], [0], [0], [1], [0, 0, 1, 1], [], []>} : vector<32x16xf32>, vector<16x32xf32>, vector<32x32xf32> -> vector<32x32xf32>
    %78 = arith.addf %73, %77 : vector<32x32xf32>
    %c448 = arith.constant 448 : index
    %c0_70 = arith.constant 0 : index
    %79 = vector.load %arg2[%c448, %c0_70] : memref<512x128xf32, #tpu.memory_space<vmem>>, vector<32x128xf32>
    %cst_71 = arith.constant dense<0.000000e+00> : vector<32x16xf32>
    %80 = tpu.matmul %79, %7, %cst_71 {dimension_numbers = #tpu.dot_dimension_numbers<[1], [0], [0], [1], [0, 0, 1, 1], [], []>} : vector<32x128xf32>, vector<128x16xf32>, vector<32x16xf32> -> vector<32x16xf32>
    %c224_72 = arith.constant 224 : index
    %c0_73 = arith.constant 0 : index
    %81 = vector.load %arg3[%c224_72, %c0_73] : memref<256x32xf32, #tpu.memory_space<vmem>>, vector<16x32xf32>
    %cst_74 = arith.constant dense<0.000000e+00> : vector<32x32xf32>
    %82 = tpu.matmul %80, %81, %cst_74 {dimension_numbers = #tpu.dot_dimension_numbers<[1], [0], [0], [1], [0, 0, 1, 1], [], []>} : vector<32x16xf32>, vector<16x32xf32>, vector<32x32xf32> -> vector<32x32xf32>
    %83 = arith.addf %78, %82 : vector<32x32xf32>
    %c480 = arith.constant 480 : index
    %c0_75 = arith.constant 0 : index
    %84 = vector.load %arg2[%c480, %c0_75] : memref<512x128xf32, #tpu.memory_space<vmem>>, vector<32x128xf32>
    %cst_76 = arith.constant dense<0.000000e+00> : vector<32x16xf32>
    %85 = tpu.matmul %84, %7, %cst_76 {dimension_numbers = #tpu.dot_dimension_numbers<[1], [0], [0], [1], [0, 0, 1, 1], [], []>} : vector<32x128xf32>, vector<128x16xf32>, vector<32x16xf32> -> vector<32x16xf32>
    %c240 = arith.constant 240 : index
    %c0_77 = arith.constant 0 : index
    %86 = vector.load %arg3[%c240, %c0_77] : memref<256x32xf32, #tpu.memory_space<vmem>>, vector<16x32xf32>
    %cst_78 = arith.constant dense<0.000000e+00> : vector<32x32xf32>
    %87 = tpu.matmul %85, %86, %cst_78 {dimension_numbers = #tpu.dot_dimension_numbers<[1], [0], [0], [1], [0, 0, 1, 1], [], []>} : vector<32x16xf32>, vector<16x32xf32>, vector<32x32xf32> -> vector<32x32xf32>
    %88 = arith.addf %83, %87 : vector<32x32xf32>
    %c0_79 = arith.constant 0 : index
    %c0_80 = arith.constant 0 : index
    %89 = vector.load %arg4[%c0_79, %c0_80] : memref<1x32xf32, #tpu.memory_space<vmem>>, vector<1x32xf32>
    %c0_81 = arith.constant 0 : index
    %c0_82 = arith.constant 0 : index
    %90 = vector.load %arg5[%c0_81, %c0_82] : memref<1x32xf32, #tpu.memory_space<vmem>>, vector<1x32xf32>
    %cst_83 = arith.constant dense<0.000000e+00> : vector<32xf32>
    %91 = vector.multi_reduction <add>, %88, %cst_83 [0] : vector<32x32xf32> to vector<32xf32>
    %92 = vector.shape_cast %91 : vector<32xf32> to vector<1x32xf32>
    %cst_84 = arith.constant 3.200000e+01 : f32
    %93 = vector.broadcast %cst_84 : f32 to vector<1x32xf32>
    %94 = arith.divf %92, %93 : vector<1x32xf32>
    %95 = vector.broadcast %94 : vector<1x32xf32> to vector<32x32xf32>
    %96 = arith.subf %88, %95 : vector<32x32xf32>
    %97 = arith.mulf %96, %96 : vector<32x32xf32>
    %cst_85 = arith.constant dense<0.000000e+00> : vector<32xf32>
    %98 = vector.multi_reduction <add>, %97, %cst_85 [0] : vector<32x32xf32> to vector<32xf32>
    %99 = vector.shape_cast %98 : vector<32xf32> to vector<1x32xf32>
    %cst_86 = arith.constant 3.200000e+01 : f32
    %100 = vector.broadcast %cst_86 : f32 to vector<1x32xf32>
    %101 = arith.divf %99, %100 : vector<1x32xf32>
    %102 = vector.broadcast %94 : vector<1x32xf32> to vector<32x32xf32>
    %103 = arith.subf %88, %102 : vector<32x32xf32>
    %cst_87 = arith.constant 9.99999974E-6 : f32
    %104 = vector.broadcast %cst_87 : f32 to vector<1x32xf32>
    %105 = arith.addf %101, %104 : vector<1x32xf32>
    %106 = math.rsqrt %105 : vector<1x32xf32>
    %107 = vector.broadcast %106 : vector<1x32xf32> to vector<32x32xf32>
    %108 = arith.mulf %103, %107 : vector<32x32xf32>
    %109 = vector.broadcast %89 : vector<1x32xf32> to vector<32x32xf32>
    %110 = arith.mulf %108, %109 : vector<32x32xf32>
    %111 = vector.broadcast %90 : vector<1x32xf32> to vector<32x32xf32>
    %112 = arith.addf %110, %111 : vector<32x32xf32>
    %cst_88 = arith.constant 0.000000e+00 : f32
    %113 = vector.broadcast %cst_88 : f32 to vector<32x32xf32>
    %114 = arith.cmpf ogt, %112, %113 : vector<32x32xf32>
    %cst_89 = arith.constant 2.000000e-01 : f32
    %115 = vector.broadcast %cst_89 : f32 to vector<32x32xf32>
    %116 = arith.mulf %115, %112 : vector<32x32xf32>
    %117 = arith.select %114, %112, %116 : vector<32x32xi1>, vector<32x32xf32>
    %cst_90 = arith.constant 0.000000e+00 : f32
    %118 = vector.broadcast %cst_90 : f32 to vector<8x64xf32>
    %c0_91 = arith.constant 0 : index
    %c0_92 = arith.constant 0 : index
    %119 = vector.load %arg6[%c0_91, %c0_92] : memref<128x32xf32, #tpu.memory_space<vmem>>, vector<8x32xf32>
    %cst_93 = arith.constant dense<0.000000e+00> : vector<8x32xf32>
    %120 = tpu.matmul %119, %117, %cst_93 {dimension_numbers = #tpu.dot_dimension_numbers<[1], [0], [0], [1], [0, 0, 1, 1], [], []>} : vector<8x32xf32>, vector<32x32xf32>, vector<8x32xf32> -> vector<8x32xf32>
    %c0_94 = arith.constant 0 : index
    %c0_95 = arith.constant 0 : index
    %121 = vector.load %arg7[%c0_94, %c0_95] : memref<512x64xf32, #tpu.memory_space<vmem>>, vector<32x64xf32>
    %cst_96 = arith.constant dense<0.000000e+00> : vector<8x64xf32>
    %122 = tpu.matmul %120, %121, %cst_96 {dimension_numbers = #tpu.dot_dimension_numbers<[1], [0], [0], [1], [0, 0, 1, 1], [], []>} : vector<8x32xf32>, vector<32x64xf32>, vector<8x64xf32> -> vector<8x64xf32>
    %123 = arith.addf %118, %122 : vector<8x64xf32>
    %c8 = arith.constant 8 : index
    %c0_97 = arith.constant 0 : index
    %124 = vector.load %arg6[%c8, %c0_97] : memref<128x32xf32, #tpu.memory_space<vmem>>, vector<8x32xf32>
    %cst_98 = arith.constant dense<0.000000e+00> : vector<8x32xf32>
    %125 = tpu.matmul %124, %117, %cst_98 {dimension_numbers = #tpu.dot_dimension_numbers<[1], [0], [0], [1], [0, 0, 1, 1], [], []>} : vector<8x32xf32>, vector<32x32xf32>, vector<8x32xf32> -> vector<8x32xf32>
    %c32_99 = arith.constant 32 : index
    %c0_100 = arith.constant 0 : index
    %126 = vector.load %arg7[%c32_99, %c0_100] : memref<512x64xf32, #tpu.memory_space<vmem>>, vector<32x64xf32>
    %cst_101 = arith.constant dense<0.000000e+00> : vector<8x64xf32>
    %127 = tpu.matmul %125, %126, %cst_101 {dimension_numbers = #tpu.dot_dimension_numbers<[1], [0], [0], [1], [0, 0, 1, 1], [], []>} : vector<8x32xf32>, vector<32x64xf32>, vector<8x64xf32> -> vector<8x64xf32>
    %128 = arith.addf %123, %127 : vector<8x64xf32>
    %c16_102 = arith.constant 16 : index
    %c0_103 = arith.constant 0 : index
    %129 = vector.load %arg6[%c16_102, %c0_103] : memref<128x32xf32, #tpu.memory_space<vmem>>, vector<8x32xf32>
    %cst_104 = arith.constant dense<0.000000e+00> : vector<8x32xf32>
    %130 = tpu.matmul %129, %117, %cst_104 {dimension_numbers = #tpu.dot_dimension_numbers<[1], [0], [0], [1], [0, 0, 1, 1], [], []>} : vector<8x32xf32>, vector<32x32xf32>, vector<8x32xf32> -> vector<8x32xf32>
    %c64_105 = arith.constant 64 : index
    %c0_106 = arith.constant 0 : index
    %131 = vector.load %arg7[%c64_105, %c0_106] : memref<512x64xf32, #tpu.memory_space<vmem>>, vector<32x64xf32>
    %cst_107 = arith.constant dense<0.000000e+00> : vector<8x64xf32>
    %132 = tpu.matmul %130, %131, %cst_107 {dimension_numbers = #tpu.dot_dimension_numbers<[1], [0], [0], [1], [0, 0, 1, 1], [], []>} : vector<8x32xf32>, vector<32x64xf32>, vector<8x64xf32> -> vector<8x64xf32>
    %133 = arith.addf %128, %132 : vector<8x64xf32>
    %c24 = arith.constant 24 : index
    %c0_108 = arith.constant 0 : index
    %134 = vector.load %arg6[%c24, %c0_108] : memref<128x32xf32, #tpu.memory_space<vmem>>, vector<8x32xf32>
    %cst_109 = arith.constant dense<0.000000e+00> : vector<8x32xf32>
    %135 = tpu.matmul %134, %117, %cst_109 {dimension_numbers = #tpu.dot_dimension_numbers<[1], [0], [0], [1], [0, 0, 1, 1], [], []>} : vector<8x32xf32>, vector<32x32xf32>, vector<8x32xf32> -> vector<8x32xf32>
    %c96_110 = arith.constant 96 : index
    %c0_111 = arith.constant 0 : index
    %136 = vector.load %arg7[%c96_110, %c0_111] : memref<512x64xf32, #tpu.memory_space<vmem>>, vector<32x64xf32>
    %cst_112 = arith.constant dense<0.000000e+00> : vector<8x64xf32>
    %137 = tpu.matmul %135, %136, %cst_112 {dimension_numbers = #tpu.dot_dimension_numbers<[1], [0], [0], [1], [0, 0, 1, 1], [], []>} : vector<8x32xf32>, vector<32x64xf32>, vector<8x64xf32> -> vector<8x64xf32>
    %138 = arith.addf %133, %137 : vector<8x64xf32>
    %c32_113 = arith.constant 32 : index
    %c0_114 = arith.constant 0 : index
    %139 = vector.load %arg6[%c32_113, %c0_114] : memref<128x32xf32, #tpu.memory_space<vmem>>, vector<8x32xf32>
    %cst_115 = arith.constant dense<0.000000e+00> : vector<8x32xf32>
    %140 = tpu.matmul %139, %117, %cst_115 {dimension_numbers = #tpu.dot_dimension_numbers<[1], [0], [0], [1], [0, 0, 1, 1], [], []>} : vector<8x32xf32>, vector<32x32xf32>, vector<8x32xf32> -> vector<8x32xf32>
    %c128_116 = arith.constant 128 : index
    %c0_117 = arith.constant 0 : index
    %141 = vector.load %arg7[%c128_116, %c0_117] : memref<512x64xf32, #tpu.memory_space<vmem>>, vector<32x64xf32>
    %cst_118 = arith.constant dense<0.000000e+00> : vector<8x64xf32>
    %142 = tpu.matmul %140, %141, %cst_118 {dimension_numbers = #tpu.dot_dimension_numbers<[1], [0], [0], [1], [0, 0, 1, 1], [], []>} : vector<8x32xf32>, vector<32x64xf32>, vector<8x64xf32> -> vector<8x64xf32>
    %143 = arith.addf %138, %142 : vector<8x64xf32>
    %c40 = arith.constant 40 : index
    %c0_119 = arith.constant 0 : index
    %144 = vector.load %arg6[%c40, %c0_119] : memref<128x32xf32, #tpu.memory_space<vmem>>, vector<8x32xf32>
    %cst_120 = arith.constant dense<0.000000e+00> : vector<8x32xf32>
    %145 = tpu.matmul %144, %117, %cst_120 {dimension_numbers = #tpu.dot_dimension_numbers<[1], [0], [0], [1], [0, 0, 1, 1], [], []>} : vector<8x32xf32>, vector<32x32xf32>, vector<8x32xf32> -> vector<8x32xf32>
    %c160_121 = arith.constant 160 : index
    %c0_122 = arith.constant 0 : index
    %146 = vector.load %arg7[%c160_121, %c0_122] : memref<512x64xf32, #tpu.memory_space<vmem>>, vector<32x64xf32>
    %cst_123 = arith.constant dense<0.000000e+00> : vector<8x64xf32>
    %147 = tpu.matmul %145, %146, %cst_123 {dimension_numbers = #tpu.dot_dimension_numbers<[1], [0], [0], [1], [0, 0, 1, 1], [], []>} : vector<8x32xf32>, vector<32x64xf32>, vector<8x64xf32> -> vector<8x64xf32>
    %148 = arith.addf %143, %147 : vector<8x64xf32>
    %c48_124 = arith.constant 48 : index
    %c0_125 = arith.constant 0 : index
    %149 = vector.load %arg6[%c48_124, %c0_125] : memref<128x32xf32, #tpu.memory_space<vmem>>, vector<8x32xf32>
    %cst_126 = arith.constant dense<0.000000e+00> : vector<8x32xf32>
    %150 = tpu.matmul %149, %117, %cst_126 {dimension_numbers = #tpu.dot_dimension_numbers<[1], [0], [0], [1], [0, 0, 1, 1], [], []>} : vector<8x32xf32>, vector<32x32xf32>, vector<8x32xf32> -> vector<8x32xf32>
    %c192_127 = arith.constant 192 : index
    %c0_128 = arith.constant 0 : index
    %151 = vector.load %arg7[%c192_127, %c0_128] : memref<512x64xf32, #tpu.memory_space<vmem>>, vector<32x64xf32>
    %cst_129 = arith.constant dense<0.000000e+00> : vector<8x64xf32>
    %152 = tpu.matmul %150, %151, %cst_129 {dimension_numbers = #tpu.dot_dimension_numbers<[1], [0], [0], [1], [0, 0, 1, 1], [], []>} : vector<8x32xf32>, vector<32x64xf32>, vector<8x64xf32> -> vector<8x64xf32>
    %153 = arith.addf %148, %152 : vector<8x64xf32>
    %c56 = arith.constant 56 : index
    %c0_130 = arith.constant 0 : index
    %154 = vector.load %arg6[%c56, %c0_130] : memref<128x32xf32, #tpu.memory_space<vmem>>, vector<8x32xf32>
    %cst_131 = arith.constant dense<0.000000e+00> : vector<8x32xf32>
    %155 = tpu.matmul %154, %117, %cst_131 {dimension_numbers = #tpu.dot_dimension_numbers<[1], [0], [0], [1], [0, 0, 1, 1], [], []>} : vector<8x32xf32>, vector<32x32xf32>, vector<8x32xf32> -> vector<8x32xf32>
    %c224_132 = arith.constant 224 : index
    %c0_133 = arith.constant 0 : index
    %156 = vector.load %arg7[%c224_132, %c0_133] : memref<512x64xf32, #tpu.memory_space<vmem>>, vector<32x64xf32>
    %cst_134 = arith.constant dense<0.000000e+00> : vector<8x64xf32>
    %157 = tpu.matmul %155, %156, %cst_134 {dimension_numbers = #tpu.dot_dimension_numbers<[1], [0], [0], [1], [0, 0, 1, 1], [], []>} : vector<8x32xf32>, vector<32x64xf32>, vector<8x64xf32> -> vector<8x64xf32>
    %158 = arith.addf %153, %157 : vector<8x64xf32>
    %c64_135 = arith.constant 64 : index
    %c0_136 = arith.constant 0 : index
    %159 = vector.load %arg6[%c64_135, %c0_136] : memref<128x32xf32, #tpu.memory_space<vmem>>, vector<8x32xf32>
    %cst_137 = arith.constant dense<0.000000e+00> : vector<8x32xf32>
    %160 = tpu.matmul %159, %117, %cst_137 {dimension_numbers = #tpu.dot_dimension_numbers<[1], [0], [0], [1], [0, 0, 1, 1], [], []>} : vector<8x32xf32>, vector<32x32xf32>, vector<8x32xf32> -> vector<8x32xf32>
    %c256_138 = arith.constant 256 : index
    %c0_139 = arith.constant 0 : index
    %161 = vector.load %arg7[%c256_138, %c0_139] : memref<512x64xf32, #tpu.memory_space<vmem>>, vector<32x64xf32>
    %cst_140 = arith.constant dense<0.000000e+00> : vector<8x64xf32>
    %162 = tpu.matmul %160, %161, %cst_140 {dimension_numbers = #tpu.dot_dimension_numbers<[1], [0], [0], [1], [0, 0, 1, 1], [], []>} : vector<8x32xf32>, vector<32x64xf32>, vector<8x64xf32> -> vector<8x64xf32>
    %163 = arith.addf %158, %162 : vector<8x64xf32>
    %c72 = arith.constant 72 : index
    %c0_141 = arith.constant 0 : index
    %164 = vector.load %arg6[%c72, %c0_141] : memref<128x32xf32, #tpu.memory_space<vmem>>, vector<8x32xf32>
    %cst_142 = arith.constant dense<0.000000e+00> : vector<8x32xf32>
    %165 = tpu.matmul %164, %117, %cst_142 {dimension_numbers = #tpu.dot_dimension_numbers<[1], [0], [0], [1], [0, 0, 1, 1], [], []>} : vector<8x32xf32>, vector<32x32xf32>, vector<8x32xf32> -> vector<8x32xf32>
    %c288_143 = arith.constant 288 : index
    %c0_144 = arith.constant 0 : index
    %166 = vector.load %arg7[%c288_143, %c0_144] : memref<512x64xf32, #tpu.memory_space<vmem>>, vector<32x64xf32>
    %cst_145 = arith.constant dense<0.000000e+00> : vector<8x64xf32>
    %167 = tpu.matmul %165, %166, %cst_145 {dimension_numbers = #tpu.dot_dimension_numbers<[1], [0], [0], [1], [0, 0, 1, 1], [], []>} : vector<8x32xf32>, vector<32x64xf32>, vector<8x64xf32> -> vector<8x64xf32>
    %168 = arith.addf %163, %167 : vector<8x64xf32>
    %c80_146 = arith.constant 80 : index
    %c0_147 = arith.constant 0 : index
    %169 = vector.load %arg6[%c80_146, %c0_147] : memref<128x32xf32, #tpu.memory_space<vmem>>, vector<8x32xf32>
    %cst_148 = arith.constant dense<0.000000e+00> : vector<8x32xf32>
    %170 = tpu.matmul %169, %117, %cst_148 {dimension_numbers = #tpu.dot_dimension_numbers<[1], [0], [0], [1], [0, 0, 1, 1], [], []>} : vector<8x32xf32>, vector<32x32xf32>, vector<8x32xf32> -> vector<8x32xf32>
    %c320_149 = arith.constant 320 : index
    %c0_150 = arith.constant 0 : index
    %171 = vector.load %arg7[%c320_149, %c0_150] : memref<512x64xf32, #tpu.memory_space<vmem>>, vector<32x64xf32>
    %cst_151 = arith.constant dense<0.000000e+00> : vector<8x64xf32>
    %172 = tpu.matmul %170, %171, %cst_151 {dimension_numbers = #tpu.dot_dimension_numbers<[1], [0], [0], [1], [0, 0, 1, 1], [], []>} : vector<8x32xf32>, vector<32x64xf32>, vector<8x64xf32> -> vector<8x64xf32>
    %173 = arith.addf %168, %172 : vector<8x64xf32>
    %c88 = arith.constant 88 : index
    %c0_152 = arith.constant 0 : index
    %174 = vector.load %arg6[%c88, %c0_152] : memref<128x32xf32, #tpu.memory_space<vmem>>, vector<8x32xf32>
    %cst_153 = arith.constant dense<0.000000e+00> : vector<8x32xf32>
    %175 = tpu.matmul %174, %117, %cst_153 {dimension_numbers = #tpu.dot_dimension_numbers<[1], [0], [0], [1], [0, 0, 1, 1], [], []>} : vector<8x32xf32>, vector<32x32xf32>, vector<8x32xf32> -> vector<8x32xf32>
    %c352_154 = arith.constant 352 : index
    %c0_155 = arith.constant 0 : index
    %176 = vector.load %arg7[%c352_154, %c0_155] : memref<512x64xf32, #tpu.memory_space<vmem>>, vector<32x64xf32>
    %cst_156 = arith.constant dense<0.000000e+00> : vector<8x64xf32>
    %177 = tpu.matmul %175, %176, %cst_156 {dimension_numbers = #tpu.dot_dimension_numbers<[1], [0], [0], [1], [0, 0, 1, 1], [], []>} : vector<8x32xf32>, vector<32x64xf32>, vector<8x64xf32> -> vector<8x64xf32>
    %178 = arith.addf %173, %177 : vector<8x64xf32>
    %c96_157 = arith.constant 96 : index
    %c0_158 = arith.constant 0 : index
    %179 = vector.load %arg6[%c96_157, %c0_158] : memref<128x32xf32, #tpu.memory_space<vmem>>, vector<8x32xf32>
    %cst_159 = arith.constant dense<0.000000e+00> : vector<8x32xf32>
    %180 = tpu.matmul %179, %117, %cst_159 {dimension_numbers = #tpu.dot_dimension_numbers<[1], [0], [0], [1], [0, 0, 1, 1], [], []>} : vector<8x32xf32>, vector<32x32xf32>, vector<8x32xf32> -> vector<8x32xf32>
    %c384_160 = arith.constant 384 : index
    %c0_161 = arith.constant 0 : index
    %181 = vector.load %arg7[%c384_160, %c0_161] : memref<512x64xf32, #tpu.memory_space<vmem>>, vector<32x64xf32>
    %cst_162 = arith.constant dense<0.000000e+00> : vector<8x64xf32>
    %182 = tpu.matmul %180, %181, %cst_162 {dimension_numbers = #tpu.dot_dimension_numbers<[1], [0], [0], [1], [0, 0, 1, 1], [], []>} : vector<8x32xf32>, vector<32x64xf32>, vector<8x64xf32> -> vector<8x64xf32>
    %183 = arith.addf %178, %182 : vector<8x64xf32>
    %c104 = arith.constant 104 : index
    %c0_163 = arith.constant 0 : index
    %184 = vector.load %arg6[%c104, %c0_163] : memref<128x32xf32, #tpu.memory_space<vmem>>, vector<8x32xf32>
    %cst_164 = arith.constant dense<0.000000e+00> : vector<8x32xf32>
    %185 = tpu.matmul %184, %117, %cst_164 {dimension_numbers = #tpu.dot_dimension_numbers<[1], [0], [0], [1], [0, 0, 1, 1], [], []>} : vector<8x32xf32>, vector<32x32xf32>, vector<8x32xf32> -> vector<8x32xf32>
    %c416_165 = arith.constant 416 : index
    %c0_166 = arith.constant 0 : index
    %186 = vector.load %arg7[%c416_165, %c0_166] : memref<512x64xf32, #tpu.memory_space<vmem>>, vector<32x64xf32>
    %cst_167 = arith.constant dense<0.000000e+00> : vector<8x64xf32>
    %187 = tpu.matmul %185, %186, %cst_167 {dimension_numbers = #tpu.dot_dimension_numbers<[1], [0], [0], [1], [0, 0, 1, 1], [], []>} : vector<8x32xf32>, vector<32x64xf32>, vector<8x64xf32> -> vector<8x64xf32>
    %188 = arith.addf %183, %187 : vector<8x64xf32>
    %c112_168 = arith.constant 112 : index
    %c0_169 = arith.constant 0 : index
    %189 = vector.load %arg6[%c112_168, %c0_169] : memref<128x32xf32, #tpu.memory_space<vmem>>, vector<8x32xf32>
    %cst_170 = arith.constant dense<0.000000e+00> : vector<8x32xf32>
    %190 = tpu.matmul %189, %117, %cst_170 {dimension_numbers = #tpu.dot_dimension_numbers<[1], [0], [0], [1], [0, 0, 1, 1], [], []>} : vector<8x32xf32>, vector<32x32xf32>, vector<8x32xf32> -> vector<8x32xf32>
    %c448_171 = arith.constant 448 : index
    %c0_172 = arith.constant 0 : index
    %191 = vector.load %arg7[%c448_171, %c0_172] : memref<512x64xf32, #tpu.memory_space<vmem>>, vector<32x64xf32>
    %cst_173 = arith.constant dense<0.000000e+00> : vector<8x64xf32>
    %192 = tpu.matmul %190, %191, %cst_173 {dimension_numbers = #tpu.dot_dimension_numbers<[1], [0], [0], [1], [0, 0, 1, 1], [], []>} : vector<8x32xf32>, vector<32x64xf32>, vector<8x64xf32> -> vector<8x64xf32>
    %193 = arith.addf %188, %192 : vector<8x64xf32>
    %c120 = arith.constant 120 : index
    %c0_174 = arith.constant 0 : index
    %194 = vector.load %arg6[%c120, %c0_174] : memref<128x32xf32, #tpu.memory_space<vmem>>, vector<8x32xf32>
    %cst_175 = arith.constant dense<0.000000e+00> : vector<8x32xf32>
    %195 = tpu.matmul %194, %117, %cst_175 {dimension_numbers = #tpu.dot_dimension_numbers<[1], [0], [0], [1], [0, 0, 1, 1], [], []>} : vector<8x32xf32>, vector<32x32xf32>, vector<8x32xf32> -> vector<8x32xf32>
    %c480_176 = arith.constant 480 : index
    %c0_177 = arith.constant 0 : index
    %196 = vector.load %arg7[%c480_176, %c0_177] : memref<512x64xf32, #tpu.memory_space<vmem>>, vector<32x64xf32>
    %cst_178 = arith.constant dense<0.000000e+00> : vector<8x64xf32>
    %197 = tpu.matmul %195, %196, %cst_178 {dimension_numbers = #tpu.dot_dimension_numbers<[1], [0], [0], [1], [0, 0, 1, 1], [], []>} : vector<8x32xf32>, vector<32x64xf32>, vector<8x64xf32> -> vector<8x64xf32>
    %198 = arith.addf %193, %197 : vector<8x64xf32>
    %c0_179 = arith.constant 0 : index
    %c0_180 = arith.constant 0 : index
    %199 = vector.load %arg8[%c0_179, %c0_180] : memref<1x64xf32, #tpu.memory_space<vmem>>, vector<1x64xf32>
    %c0_181 = arith.constant 0 : index
    %c0_182 = arith.constant 0 : index
    %200 = vector.load %arg9[%c0_181, %c0_182] : memref<1x64xf32, #tpu.memory_space<vmem>>, vector<1x64xf32>
    %cst_183 = arith.constant dense<0.000000e+00> : vector<64xf32>
    %201 = vector.multi_reduction <add>, %198, %cst_183 [0] : vector<8x64xf32> to vector<64xf32>
    %202 = vector.shape_cast %201 : vector<64xf32> to vector<1x64xf32>
    %cst_184 = arith.constant 8.000000e+00 : f32
    %203 = vector.broadcast %cst_184 : f32 to vector<1x64xf32>
    %204 = arith.divf %202, %203 : vector<1x64xf32>
    %205 = vector.broadcast %204 : vector<1x64xf32> to vector<8x64xf32>
    %206 = arith.subf %198, %205 : vector<8x64xf32>
    %207 = arith.mulf %206, %206 : vector<8x64xf32>
    %cst_185 = arith.constant dense<0.000000e+00> : vector<64xf32>
    %208 = vector.multi_reduction <add>, %207, %cst_185 [0] : vector<8x64xf32> to vector<64xf32>
    %209 = vector.shape_cast %208 : vector<64xf32> to vector<1x64xf32>
    %cst_186 = arith.constant 8.000000e+00 : f32
    %210 = vector.broadcast %cst_186 : f32 to vector<1x64xf32>
    %211 = arith.divf %209, %210 : vector<1x64xf32>
    %212 = vector.broadcast %204 : vector<1x64xf32> to vector<8x64xf32>
    %213 = arith.subf %198, %212 : vector<8x64xf32>
    %cst_187 = arith.constant 9.99999974E-6 : f32
    %214 = vector.broadcast %cst_187 : f32 to vector<1x64xf32>
    %215 = arith.addf %211, %214 : vector<1x64xf32>
    %216 = math.rsqrt %215 : vector<1x64xf32>
    %217 = vector.broadcast %216 : vector<1x64xf32> to vector<8x64xf32>
    %218 = arith.mulf %213, %217 : vector<8x64xf32>
    %219 = vector.broadcast %199 : vector<1x64xf32> to vector<8x64xf32>
    %220 = arith.mulf %218, %219 : vector<8x64xf32>
    %221 = vector.broadcast %200 : vector<1x64xf32> to vector<8x64xf32>
    %222 = arith.addf %220, %221 : vector<8x64xf32>
    %cst_188 = arith.constant 0.000000e+00 : f32
    %223 = vector.broadcast %cst_188 : f32 to vector<8x64xf32>
    %224 = arith.cmpf ogt, %222, %223 : vector<8x64xf32>
    %cst_189 = arith.constant 2.000000e-01 : f32
    %225 = vector.broadcast %cst_189 : f32 to vector<8x64xf32>
    %226 = arith.mulf %225, %222 : vector<8x64xf32>
    %227 = arith.select %224, %222, %226 : vector<8x64xi1>, vector<8x64xf32>
    %c0_190 = arith.constant 0 : index
    %c0_191 = arith.constant 0 : index
    %228 = vector.load %arg10[%c0_190, %c0_191] : memref<8x64xf32, #tpu.memory_space<vmem>>, vector<8x64xf32>
    %229 = arith.mulf %227, %228 : vector<8x64xf32>
    %230 = vector.extract_strided_slice %229 {offsets = [0, 0], sizes = [4, 64], strides = [1, 1]} : vector<8x64xf32> to vector<4x64xf32>
    %231 = vector.shape_cast %230 : vector<4x64xf32> to vector<1x4x64xf32>
    %cst_192 = arith.constant dense<0.000000e+00> : vector<1xf32>
    %232 = vector.multi_reduction <add>, %231, %cst_192 [1, 2] : vector<1x4x64xf32> to vector<1xf32>
    %233 = vector.shape_cast %232 : vector<1xf32> to vector<1x1x1xf32>
    %234 = vector.extract %233[0, 0, 0] : f32 from vector<1x1x1xf32>
    %235 = vector.broadcast %234 : f32 to vector<1x1xf32>
    %cst_193 = arith.constant 0.000000e+00 : f32
    %236 = vector.broadcast %cst_193 : f32 to vector<1x1xf32>
    %237 = arith.subf %236, %235 : vector<1x1xf32>
    %238 = math.exp %237 : vector<1x1xf32>
    %cst_194 = arith.constant 1.000000e+00 : f32
    %239 = vector.broadcast %cst_194 : f32 to vector<1x1xf32>
    %240 = arith.addf %239, %238 : vector<1x1xf32>
    %cst_195 = arith.constant 1.000000e+00 : f32
    %241 = vector.broadcast %cst_195 : f32 to vector<1x1xf32>
    %242 = arith.divf %241, %240 : vector<1x1xf32>
    %c0_196 = arith.constant 0 : index
    %c0_197 = arith.constant 0 : index
    %243 = vector.load %arg11[%c0_196, %c0_197] : memref<2x1xf32, #tpu.memory_space<vmem>>, vector<1x1xf32>
    tpu.vector_store %arg11[%c0_196, %c0_197], %242 {strides = array<i32>} : memref<2x1xf32, #tpu.memory_space<vmem>>, vector<1x1xf32>,
    %244 = vector.extract_strided_slice %229 {offsets = [4, 0], sizes = [4, 64], strides = [1, 1]} : vector<8x64xf32> to vector<4x64xf32>
    %245 = vector.shape_cast %244 : vector<4x64xf32> to vector<1x4x64xf32>
    %cst_198 = arith.constant dense<0.000000e+00> : vector<1xf32>
    %246 = vector.multi_reduction <add>, %245, %cst_198 [1, 2] : vector<1x4x64xf32> to vector<1xf32>
    %247 = vector.shape_cast %246 : vector<1xf32> to vector<1x1x1xf32>
    %248 = vector.extract %247[0, 0, 0] : f32 from vector<1x1x1xf32>
    %249 = vector.broadcast %248 : f32 to vector<1x1xf32>
    %cst_199 = arith.constant 0.000000e+00 : f32
    %250 = vector.broadcast %cst_199 : f32 to vector<1x1xf32>
    %251 = arith.subf %250, %249 : vector<1x1xf32>
    %252 = math.exp %251 : vector<1x1xf32>
    %cst_200 = arith.constant 1.000000e+00 : f32
    %253 = vector.broadcast %cst_200 : f32 to vector<1x1xf32>
    %254 = arith.addf %253, %252 : vector<1x1xf32>
    %cst_201 = arith.constant 1.000000e+00 : f32
    %255 = vector.broadcast %cst_201 : f32 to vector<1x1xf32>
    %256 = arith.divf %255, %254 : vector<1x1xf32>
    %c1 = arith.constant 1 : index
    %c0_202 = arith.constant 0 : index
    %257 = vector.load %arg11[%c1, %c0_202] : memref<2x1xf32, #tpu.memory_space<vmem>>, vector<1x1xf32>
    tpu.vector_store %arg11[%c1, %c0_202], %256 {strides = array<i32>} : memref<2x1xf32, #tpu.memory_space<vmem>>, vector<1x1xf32>,
    return
  }
}

</mosaic_0001>

<bundles_post_ra>
// kernel: discriminator_forward.1
= control target key start
LH: loop header
LB: loop body
LE: loop exit
PB: predicated region body
PF: predicated region fallthrough
CT: control target
= control target key end

     0   :  { %vm56_vm0 = vcmask 130048   ;;  %s9944_s1 = inlined_call_operand.vmem [shape: f32[16,16], index: 1, kind: input, shape index: {}]   ;;  %s9945_s0 = inlined_call_operand.vmem [shape: f32[128,16], index: 0, kind: input, shape index: {}]   ;;  %s9946_s2 = inlined_call_operand.vmem [shape: f32[512,128], index: 2, kind: input, shape index: {}]   ;;  %s9947_s3 = inlined_call_operand.vmem [shape: f32[256,32], index: 3, kind: input, shape index: {}]   ;;  %s9948_s4 = inlined_call_operand.vmem [shape: f32[1,32], index: 4, kind: input, shape index: {}]   ;;  %s9949_s5 = inlined_call_operand.vmem [shape: f32[1,32], index: 5, kind: input, shape index: {}]   ;;  %s9950_s7 = inlined_call_operand.vmem [shape: f32[512,64], index: 7, kind: input, shape index: {}]   ;;  %s9951_s6 = inlined_call_operand.vmem [shape: f32[128,32], index: 6, kind: input, shape index: {}]   ;;  %s9952_s8 = inlined_call_operand.vmem [shape: f32[1,64], index: 8, kind: input, shape index: {}]   ;;  %s9953_s9 = inlined_call_operand.vmem [shape: f32[1,64], index: 9, kind: input, shape index: {}]   ;;  %s9954_s10 = inlined_call_operand.vmem [shape: f32[8,64], index: 10, kind: input, shape index: {}]   ;;  %s9955_s11 = inlined_call_operand.vmem [shape: f32[2,1], index: 11, kind: output, shape index: {}]  }
   0x1   :  { %v54_v0 = vld [vmem:[%s9944_s1] sm:$0xff]  ;;  %v55_v1 = vld [vmem:[%s9944_s1 + $0x8] sm:$0xff]  ;;  %v40_v5 = vld [vmem:[%s9945_s0 + $0x10] sm:$0xff] }
   0x2   :  { %v38_v2 = vld [vmem:[%s9945_s0] sm:$0xff]  ;;  %v7817_v3 = vpack.c.bf16 %v55_v1, %v54_v0  ;;  %v39_v4 = vld [vmem:[%s9945_s0 + $0x8] sm:$0xff]  ;;  %v41_v6 = vld [vmem:[%s9945_s0 + $0x18] sm:$0xff] }
   0x3   :  { %6673 = vmatprep.mubr.msk.f32.mxu0 %vm56_vm0, %v38_v2  ;;  %v42_v7 = vld [vmem:[%s9945_s0 + $0x20] sm:$0xff]  ;;  %v43_v8 = vld [vmem:[%s9945_s0 + $0x28] sm:$0xff]  ;;  %v44_v9 = vld [vmem:[%s9945_s0 + $0x30] sm:$0xff] }
   0x4   :  { %7818 = vmatprep.subr.bf16.mxu0 %v7817_v3  ;;  %v45_v10 = vld [vmem:[%s9945_s0 + $0x38] sm:$0xff]  ;;  %v46_v11 = vld [vmem:[%s9945_s0 + $0x40] sm:$0xff]  ;;  %v47_v12 = vld [vmem:[%s9945_s0 + $0x48] sm:$0xff] }
   0x5   :  { %7820 = vmatpush3.bf16.msra.mxu0 %v7817_v3  ;;  %v48_v13 = vld [vmem:[%s9945_s0 + $0x50] sm:$0xff]  ;;  %v49_v14 = vld [vmem:[%s9945_s0 + $0x58] sm:$0xff]  ;;  %v50_v15 = vld [vmem:[%s9945_s0 + $0x60] sm:$0xff] }
   0x6   :  { %v51_v16 = vld [vmem:[%s9945_s0 + $0x68] sm:$0xff]  ;;  %v52_v17 = vld [vmem:[%s9945_s0 + $0x70] sm:$0xff]  ;;  %v53_v18 = vld [vmem:[%s9945_s0 + $0x78] sm:$0xff] }
   0x7   :  { %v298_v19 = vld [vmem:[%s9946_s2] sm:$0xff] }
   0x8   :  { %6674 = vmatmul.mubr.msk.f32.vlgmr.msra.gmra.mrb[0].mxu0 %vm56_vm0, %v39_v4  ;;  %v389_v20 = vld [vmem:[%s9946_s2 + $0x20] sm:$0xff]  ;;  %6729 = vmatprep.mubr.f32.mxu1 %v298_v19  ;;  %v299_v19 = vld [vmem:[%s9946_s2 + $0x8] sm:$0xff] }
   0x9   :  { %6676 = vmatprep.mubr.msk.f32.mxu0 %vm56_vm0, %v40_v5 }
   0xc   :  { %6677 = vmatmul.mubr.msk.f32.gmra.mrb[2].mxu0 %vm56_vm0, %v41_v6 }
   0xd   :  { %6679 = vmatprep.mubr.msk.f32.mxu0 %vm56_vm0, %v42_v7 }
  0x10   :  { %6680 = vmatmul.mubr.msk.f32.gmra.mrb[4].mxu0 %vm56_vm0, %v43_v8 }
  0x11   :  { %6682 = vmatprep.mubr.msk.f32.mxu0 %vm56_vm0, %v44_v9  ;;  %v478_v9 = vld [vmem:[%s9947_s3 + $0x10] sm:$0xff] }
  0x14   :  { %6683 = vmatmul.mubr.msk.f32.gmra.mrb[6].mxu0 %vm56_vm0, %v45_v10 }
  0x15   :  { %6685 = vmatprep.mubr.msk.f32.mxu0 %vm56_vm0, %v46_v11  ;;  %v479_v11 = vld [vmem:[%s9947_s3 + $0x18] sm:$0xff] }
  0x18   :  { %6686 = vmatmul.mubr.msk.f32.gmra.mrb[8].mxu0 %vm56_vm0, %v47_v12  ;;  %v387_v12 = vld [vmem:[%s9947_s3] sm:$0xff] }
  0x19   :  { %6688 = vmatprep.mubr.msk.f32.mxu0 %vm56_vm0, %v48_v13  ;;  %v388_v13 = vld [vmem:[%s9947_s3 + $0x8] sm:$0xff] }
  0x1c   :  { %6689 = vmatmul.mubr.msk.f32.gmra.mrb[10].mxu0 %vm56_vm0, %v49_v14 }
  0x1d   :  { %6691 = vmatprep.mubr.msk.f32.mxu0 %vm56_vm0, %v50_v15 }
  0x20   :  { %6692 = vmatmul.mubr.msk.f32.gmra.mrb[12].mxu0 %vm56_vm0, %v51_v16 }
  0x21   :  { %6694 = vmatprep.mubr.msk.f32.mxu0 %vm56_vm0, %v52_v17  ;;  %v7885_v17 = vpack.c.bf16 %v479_v11, %v478_v9  ;;  %v2596_v9 = vld [vmem:[%s9946_s2 + $0x190] sm:$0xff]  ;;  %v2786_v11 = vld [vmem:[%s9946_s2 + $0x1a0] sm:$0xff] }
  0x24   :  { %6695 = vmatmul.mubr.msk.f32.gmra.mrb[14].mxu0 %vm56_vm0, %v53_v18  ;;  %v7889_v18 = vpack.c.bf16 %v388_v13, %v387_v12 }
  0x25   :  { %6767 = vmatprep.mubr.f32.mxu0 %v389_v20  ;;  %v390_v20 = vld [vmem:[%s9946_s2 + $0x28] sm:$0xff] }
  0xdb   :  { %v6675_v21 = vpop.f32.mrb[0].mxu0 }
  0xdc   :  { %vm251_vm1 = vcmp.gt.f32.partialorder %v6675_v21, 0.0  ;;  %v267_v22 = vmul.f32 0.2, %v6675_v21  ;;  %v171_v23 = vpop.f32.mrb[1].mxu0 }
  0xdd   :  { %vm250_vm2 = vcmp.gt.f32.partialorder %v171_v23, 0.0  ;;  %v266_v24 = vmul.f32 0.2, %v171_v23 }
  0xde   :  { %v283_v25 = vsel %vm251_vm1, %v6675_v21, %v267_v22  ;;  %v391_v21 = vld [vmem:[%s9946_s2 + $0x30] sm:$0xff] }
  0xdf   :  { %v282_v26 = vsel %vm250_vm2, %v171_v23, %v266_v24  ;;  %v6678_v27 = vpop.f32.mrb[2].mxu0  ;;  %v300_v22 = vld [vmem:[%s9946_s2 + $0x10] sm:$0xff]  ;;  %v392_v23 = vld [vmem:[%s9946_s2 + $0x38] sm:$0xff]  ;;  %vm8699_vm2 = vmmov 0  }
  0xe0   :  { %v8837_v28 = vpack.c.bf16 %v283_v25, %v282_v26  ;;  %vm253_vm3 = vcmp.gt.f32.partialorder %v6678_v27, 0.0  ;;  %v269_v29 = vmul.f32 0.2, %v6678_v27  ;;  %v181_v30 = vpop.f32.mrb[3].mxu0  ;;  %v301_v24 = vld [vmem:[%s9946_s2 + $0x18] sm:$0xff]  ;;  %v763_v25 = vld [vmem:[%s9947_s3 + $0x20] sm:$0xff] }
  0xe1   :  { %vm252_vm4 = vcmp.gt.f32.partialorder %v181_v30, 0.0  ;;  %v268_v31 = vmul.f32 0.2, %v181_v30  ;;  %v764_v26 = vld [vmem:[%s9947_s3 + $0x28] sm:$0xff] }
  0xe2   :  { %v285_v32 = vsel %vm253_vm3, %v6678_v27, %v269_v29  ;;  %7822 = vmatprep.subr.bf16.mxu1 %v8837_v28  ;;  %7854 = vmatprep.subr.bf16.mxu0 %v8837_v28  ;;  %v7925_v27 = vpack.c.bf16 %v764_v26, %v763_v25  ;;  %v869_v26 = vld [vmem:[%s9946_s2 + $0x78] sm:$0xff]  ;;  %vm3364_vm3 = vcmask 261120  }
  0xe3   :  { %v284_v33 = vsel %vm252_vm4, %v181_v30, %v268_v31  ;;  %v6681_v34 = vpop.f32.mrb[4].mxu0  ;;  %7824 = vmatpush3.bf16.msra.mxu1 %v8837_v28  ;;  %7856 = vmatpush3.bf16.msra.mxu0 %v8837_v28 }
  0xe4   :  { %v8843_v35 = vpack.c.bf16 %v285_v32, %v284_v33  ;;  %vm255_vm5 = vcmp.gt.f32.partialorder %v6681_v34, 0.0  ;;  %v271_v36 = vmul.f32 0.2, %v6681_v34  ;;  %v191_v37 = vpop.f32.mrb[5].mxu0 }
  0xe5   :  { %vm254_vm6 = vcmp.gt.f32.partialorder %v191_v37, 0.0  ;;  %v270_v38 = vmul.f32 0.2, %v191_v37 }
  0xe6   :  { %v287_v39 = vsel %vm255_vm5, %v6681_v34, %v271_v36  ;;  %7826 = vmatprep.subr.bf16.mxu1 %v8843_v35  ;;  %7858 = vmatprep.subr.bf16.mxu0 %v8843_v35  ;;  %v674_v36 = vld [vmem:[%s9946_s2 + $0x40] sm:$0xff] }
  0xe7   :  { %v286_v40 = vsel %vm254_vm6, %v191_v37, %v270_v38  ;;  %v6684_v41 = vpop.f32.mrb[6].mxu0  ;;  %7828 = vmatpush3.bf16.msra.mxu1 %v8843_v35  ;;  %7860 = vmatpush3.bf16.msra.mxu0 %v8843_v35  ;;  %v675_v37 = vld [vmem:[%s9946_s2 + $0x48] sm:$0xff]  ;;  %v676_v38 = vld [vmem:[%s9946_s2 + $0x50] sm:$0xff] }
  0xe8   :  { %v8849_v42 = vpack.c.bf16 %v287_v39, %v286_v40  ;;  %vm257_vm7 = vcmp.gt.f32.partialorder %v6684_v41, 0.0  ;;  %v273_v43 = vmul.f32 0.2, %v6684_v41  ;;  %v201_v44 = vpop.f32.mrb[7].mxu0  ;;  %v677_v39 = vld [vmem:[%s9946_s2 + $0x58] sm:$0xff]  ;;  %v1058_v40 = vld [vmem:[%s9946_s2 + $0x80] sm:$0xff] }
  0xe9   :  { %vm256_vm8 = vcmp.gt.f32.partialorder %v201_v44, 0.0  ;;  %v272_v45 = vmul.f32 0.2, %v201_v44 }
  0xea   :  { %v289_v46 = vsel %vm257_vm7, %v6684_v41, %v273_v43  ;;  %7830 = vmatprep.subr.bf16.mxu1 %v8849_v42  ;;  %7862 = vmatprep.subr.bf16.mxu0 %v8849_v42  ;;  %v1059_v41 = vld [vmem:[%s9946_s2 + $0x88] sm:$0xff]  ;;  %v1060_v43 = vld [vmem:[%s9946_s2 + $0x90] sm:$0xff]  ;;  %vm5872_vm7 = vcmask 523264  }
  0xeb   :  { %v288_v47 = vsel %vm256_vm8, %v201_v44, %v272_v45  ;;  %v6687_v48 = vpop.f32.mrb[8].mxu0  ;;  %7832 = vmatpush3.bf16.msra.mxu1 %v8849_v42  ;;  %7864 = vmatpush3.bf16.msra.mxu0 %v8849_v42  ;;  %v1061_v44 = vld [vmem:[%s9946_s2 + $0x98] sm:$0xff]  ;;  %v1250_v45 = vld [vmem:[%s9946_s2 + $0xa0] sm:$0xff] }
  0xec   :  { %v8855_v49 = vpack.c.bf16 %v289_v46, %v288_v47  ;;  %vm259_vm9 = vcmp.gt.f32.partialorder %v6687_v48, 0.0  ;;  %v275_v50 = vmul.f32 0.2, %v6687_v48  ;;  %v211_v51 = vpop.f32.mrb[9].mxu0  ;;  %v1251_v46 = vld [vmem:[%s9946_s2 + $0xa8] sm:$0xff]  ;;  %v1252_v47 = vld [vmem:[%s9946_s2 + $0xb0] sm:$0xff] }
  0xed   :  { %vm258_vm10 = vcmp.gt.f32.partialorder %v211_v51, 0.0  ;;  %v274_v52 = vmul.f32 0.2, %v211_v51 }
  0xee   :  { %v291_v53 = vsel %vm259_vm9, %v6687_v48, %v275_v50  ;;  %7834 = vmatprep.subr.bf16.mxu1 %v8855_v49  ;;  %7866 = vmatprep.subr.bf16.mxu0 %v8855_v49  ;;  %v1253_v48 = vld [vmem:[%s9946_s2 + $0xb8] sm:$0xff]  ;;  %v1634_v50 = vld [vmem:[%s9946_s2 + $0xe0] sm:$0xff]  ;;  %vm5914_vm9 = vcmask 519168  }
  0xef   :  { %v290_v54 = vsel %vm258_vm10, %v211_v51, %v274_v52  ;;  %v6690_v55 = vpop.f32.mrb[10].mxu0  ;;  %7836 = vmatpush3.bf16.msra.mxu1 %v8855_v49  ;;  %7868 = vmatpush3.bf16.msra.mxu0 %v8855_v49  ;;  %vm5932_vm10 = vcmask 0  }
  0xf0   :  { %v8861_v56 = vpack.c.bf16 %v291_v53, %v290_v54  ;;  %vm261_vm11 = vcmp.gt.f32.partialorder %v6690_v55, 0.0  ;;  %v277_v57 = vmul.f32 0.2, %v6690_v55  ;;  %v221_v58 = vpop.f32.mrb[11].mxu0  ;;  %v1635_v53 = vld [vmem:[%s9946_s2 + $0xe8] sm:$0xff]  ;;  %v1636_v54 = vld [vmem:[%s9946_s2 + $0xf0] sm:$0xff] }
  0xf1   :  { %vm260_vm12 = vcmp.gt.f32.partialorder %v221_v58, 0.0  ;;  %v276_v59 = vmul.f32 0.2, %v221_v58 }
  0xf2   :  { %v293_v60 = vsel %vm261_vm11, %v6690_v55, %v277_v57  ;;  %7838 = vmatprep.subr.bf16.mxu1 %v8861_v56  ;;  %7870 = vmatprep.subr.bf16.mxu0 %v8861_v56  ;;  %v1637_v55 = vld [vmem:[%s9946_s2 + $0xf8] sm:$0xff]  ;;  %v2018_v57 = vld [vmem:[%s9946_s2 + $0x120] sm:$0xff] }
  0xf3   :  { %v292_v61 = vsel %vm260_vm12, %v221_v58, %v276_v59  ;;  %v6693_v62 = vpop.f32.mrb[12].mxu0  ;;  %7840 = vmatpush3.bf16.msra.mxu1 %v8861_v56  ;;  %7872 = vmatpush3.bf16.msra.mxu0 %v8861_v56  ;;  %v2019_v58 = vld [vmem:[%s9946_s2 + $0x128] sm:$0xff]  ;;  %v2020_v59 = vld [vmem:[%s9946_s2 + $0x130] sm:$0xff] }
  0xf4   :  { %v8867_v63 = vpack.c.bf16 %v293_v60, %v292_v61  ;;  %vm263_vm13 = vcmp.gt.f32.partialorder %v6693_v62, 0.0  ;;  %v279_v0 = vmul.f32 0.2, %v6693_v62  ;;  %v231_v1 = vpop.f32.mrb[13].mxu0  ;;  %v2021_v60 = vld [vmem:[%s9946_s2 + $0x138] sm:$0xff]  ;;  %v2210_v61 = vld [vmem:[%s9946_s2 + $0x140] sm:$0xff] }
  0xf5   :  { %vm262_vm14 = vcmp.gt.f32.partialorder %v231_v1, 0.0  ;;  %v278_v2 = vmul.f32 0.2, %v231_v1 }
  0xf6   :  { %v295_v3 = vsel %vm263_vm13, %v6693_v62, %v279_v0  ;;  %7842 = vmatprep.subr.bf16.mxu1 %v8867_v63  ;;  %7874 = vmatprep.subr.bf16.mxu0 %v8867_v63  ;;  %v2211_v62 = vld [vmem:[%s9946_s2 + $0x148] sm:$0xff]  ;;  %v2212_v0 = vld [vmem:[%s9946_s2 + $0x150] sm:$0xff] }
  0xf7   :  { %v294_v4 = vsel %vm262_vm14, %v231_v1, %v278_v2  ;;  %v6696_v5 = vpop.f32.mrb[14].mxu0  ;;  %7844 = vmatpush3.bf16.msra.mxu1 %v8867_v63  ;;  %7876 = vmatpush3.bf16.msra.mxu0 %v8867_v63  ;;  %v2213_v1 = vld [vmem:[%s9946_s2 + $0x158] sm:$0xff]  ;;  %v2594_v2 = vld [vmem:[%s9946_s2 + $0x180] sm:$0xff] }
  0xf8   :  { %v8873_v6 = vpack.c.bf16 %v295_v3, %v294_v4  ;;  %vm265_vm15 = vcmp.gt.f32.partialorder %v6696_v5, 0.0  ;;  %v281_v7 = vmul.f32 0.2, %v6696_v5  ;;  %v241_v8 = vpop.f32.mrb[15].mxu0 }
  0xf9   :  { %vm264_vm1 = vcmp.gt.f32.partialorder %v241_v8, 0.0  ;;  %v280_v10 = vmul.f32 0.2, %v241_v8 }
  0xfa   :  { %v297_v14 = vsel %vm265_vm15, %v6696_v5, %v281_v7  ;;  %7846 = vmatprep.subr.bf16.mxu1 %v8873_v6  ;;  %7878 = vmatprep.subr.bf16.mxu0 %v8873_v6 }
  0xfb   :  { %v296_v15 = vsel %vm264_vm1, %v241_v8, %v280_v10  ;;  %7848 = vmatpush3.bf16.msra.mxu1 %v8873_v6  ;;  %7880 = vmatpush3.bf16.msra.mxu0 %v8873_v6  ;;  %v2595_v8 = vld [vmem:[%s9946_s2 + $0x188] sm:$0xff]  ;;  %v2597_v10 = vld [vmem:[%s9946_s2 + $0x198] sm:$0xff] }
  0xfc   :  { %v8891_v16 = vpack.c.bf16 %v297_v14, %v296_v15 }
  0xfe   :  { %7850 = vmatprep.subr.bf16.mxu1 %v8891_v16  ;;  %7882 = vmatprep.subr.bf16.mxu0 %v8891_v16 }
  0xff   :  { %7852 = vmatpush3.bf16.msra.mxu1 %v8891_v16  ;;  %7884 = vmatpush3.bf16.msra.mxu0 %v8891_v16 }
 0x100   :  { %7886 = vmatprep.subr.bf16.mxu0 %v7885_v17  ;;  %7890 = vmatprep.subr.bf16.mxu1 %v7889_v18 }
 0x102   :  { %6730 = vmatmul.mubr.f32.vlgmr.msra.gmra.mrb[0].mxu1 %v299_v19  ;;  %6768 = vmatmul.mubr.f32.vlgmr.msra.gmra.mrb[16].mxu0 %v390_v20  ;;  %v955_v19 = vld [vmem:[%s9947_s3 + $0x30] sm:$0xff]  ;;  %v956_v20 = vld [vmem:[%s9947_s3 + $0x38] sm:$0xff] }
 0x103   :  { %7888 = vmatpush3.bf16.msra.mxu0 %v7885_v17  ;;  %6770 = vmatprep.mubr.f32.mxu0 %v391_v21  ;;  %v866_v17 = vld [vmem:[%s9946_s2 + $0x60] sm:$0xff]  ;;  %v7961_v21 = vpack.c.bf16 %v956_v20, %v955_v19  ;;  %v2108_v19 = vld [vmem:[%s9947_s3 + $0x98] sm:$0xff] }
 0x104   :  { %7894 = vmatprep.subr.bf16.mxu0 %v8837_v28  ;;  %6732 = vmatprep.mubr.f32.mxu1 %v300_v22  ;;  %v867_v22 = vld [vmem:[%s9946_s2 + $0x68] sm:$0xff] }
 0x105   :  { %7892 = vmatpush3.bf16.msra.mxu1 %v7889_v18  ;;  %v2787_v18 = vld [vmem:[%s9946_s2 + $0x1a8] sm:$0xff] }
 0x106   :  { %6771 = vmatmul.mubr.f32.gmra.mrb[18].mxu0 %v392_v23  ;;  %6733 = vmatmul.mubr.f32.gmra.mrb[2].mxu1 %v301_v24  ;;  %v868_v24 = vld [vmem:[%s9946_s2 + $0x70] sm:$0xff] }
 0x107   :  { %7926 = vmatprep.subr.bf16.mxu1 %v7925_v27 }
 0x1d5   :  { %v6731_v29 = vpop.f32.mrb[0].mxu1  ;;  %v6769_v30 = vpop.f32.mrb[16].mxu0 }
 0x1d6   :  { %v368_v31 = vpop.f32.mrb[1].mxu1  ;;  %v459_v32 = vpop.f32.mrb[17].mxu0 }
 0x1d7   :  { %6777 = vmatprep.mubr.msk.f32.mxu0 %vm56_vm0, %v459_v32  ;;  %6787 = vmatprep.mubr.msk.f32.mxu1 %vm56_vm0, %v368_v31 }
 0x1d8   :  { %6778 = vmatmul.mubr.msk.f32.vlgmr.msra.gmra.mrb[20].mxu0 %vm56_vm0, %v6769_v30  ;;  %6788 = vmatmul.mubr.msk.f32.vlgmr.msra.gmra.mrb[4].mxu1 %vm56_vm0, %v6731_v29  ;;  %v1148_v29 = vld [vmem:[%s9947_s3 + $0x48] sm:$0xff] }
 0x1d9   :  { %7896 = vmatpush3.bf16.msra.mxu0 %v8837_v28  ;;  %7928 = vmatpush3.bf16.msra.mxu1 %v7925_v27  ;;  %v6772_v33 = vpop.f32.mrb[18].mxu0  ;;  %v6734_v51 = vpop.f32.mrb[2].mxu1  ;;  %v1147_v27 = vld [vmem:[%s9947_s3 + $0x40] sm:$0xff] }
 0x1da   :  { %7898 = vmatprep.subr.bf16.mxu0 %v8843_v35  ;;  %7930 = vmatprep.subr.bf16.mxu1 %v8837_v28  ;;  %v469_v34 = vpop.f32.mrb[19].mxu0  ;;  %v378_v52 = vpop.f32.mrb[3].mxu1  ;;  %v7997_v30 = vpack.c.bf16 %v1148_v29, %v1147_v27  ;;  %v2788_v27 = vld [vmem:[%s9946_s2 + $0x1b0] sm:$0xff]  ;;  %v2789_v29 = vld [vmem:[%s9946_s2 + $0x1b8] sm:$0xff] }
 0x1db   :  { %6780 = vmatprep.mubr.msk.f32.mxu0 %vm56_vm0, %v469_v34  ;;  %6790 = vmatprep.mubr.msk.f32.mxu1 %vm56_vm0, %v378_v52  ;;  %v1444_v52 = vld [vmem:[%s9946_s2 + $0xd0] sm:$0xff] }
 0x1dc   :  { %6781 = vmatmul.mubr.msk.f32.gmra.mrb[22].mxu0 %vm56_vm0, %v6772_v33  ;;  %6791 = vmatmul.mubr.msk.f32.gmra.mrb[6].mxu1 %vm56_vm0, %v6734_v51  ;;  %v1443_v51 = vld [vmem:[%s9946_s2 + $0xc8] sm:$0xff] }
 0x1dd   :  { %7900 = vmatpush3.bf16.msra.mxu0 %v8843_v35  ;;  %6825 = vmatprep.mubr.f32.mxu0 %v674_v36 }
 0x1de   :  { %7902 = vmatprep.subr.bf16.mxu0 %v8849_v42 }
 0x1e1   :  { %7904 = vmatpush3.bf16.msra.mxu0 %v8849_v42 }
 0x1e2   :  { %7906 = vmatprep.subr.bf16.mxu0 %v8855_v49 }
 0x1e5   :  { %7908 = vmatpush3.bf16.msra.mxu0 %v8855_v49 }
 0x1e6   :  { %7910 = vmatprep.subr.bf16.mxu0 %v8861_v56 }
 0x1e9   :  { %7912 = vmatpush3.bf16.msra.mxu0 %v8861_v56 }
 0x1ea   :  { %7914 = vmatprep.subr.bf16.mxu0 %v8867_v63 }
 0x1ed   :  { %7916 = vmatpush3.bf16.msra.mxu0 %v8867_v63 }
 0x1ee   :  { %7918 = vmatprep.subr.bf16.mxu0 %v8873_v6 }
 0x1f1   :  { %7920 = vmatpush3.bf16.msra.mxu0 %v8873_v6 }
 0x1f2   :  { %7922 = vmatprep.subr.bf16.mxu0 %v8891_v16 }
 0x1f5   :  { %7924 = vmatpush3.bf16.msra.mxu0 %v8891_v16 }
 0x1f6   :  { %7966 = vmatprep.subr.bf16.mxu0 %v8837_v28 }
 0x1f8   :  { %6826 = vmatmul.mubr.f32.vlgmr.msra.gmra.mrb[24].mxu0 %v675_v37 }
 0x1f9   :  { %7968 = vmatpush3.bf16.msra.mxu0 %v8837_v28  ;;  %6828 = vmatprep.mubr.f32.mxu0 %v676_v38  ;;  %v1339_v38 = vld [vmem:[%s9947_s3 + $0x50] sm:$0xff] }
 0x1fa   :  { %7970 = vmatprep.subr.bf16.mxu0 %v8843_v35 }
 0x1fc   :  { %6829 = vmatmul.mubr.f32.gmra.mrb[26].mxu0 %v677_v39  ;;  %v1340_v39 = vld [vmem:[%s9947_s3 + $0x58] sm:$0xff] }
 0x1fd   :  { %7972 = vmatpush3.bf16.msra.mxu0 %v8843_v35  ;;  %6921 = vmatprep.mubr.f32.mxu0 %v1058_v40 }
 0x1fe   :  { %7974 = vmatprep.subr.bf16.mxu0 %v8849_v42 }
 0x201   :  { %7976 = vmatpush3.bf16.msra.mxu0 %v8849_v42 }
 0x202   :  { %7978 = vmatprep.subr.bf16.mxu0 %v8855_v49 }
 0x205   :  { %7980 = vmatpush3.bf16.msra.mxu0 %v8855_v49 }
 0x206   :  { %7982 = vmatprep.subr.bf16.mxu0 %v8861_v56 }
 0x209   :  { %7984 = vmatpush3.bf16.msra.mxu0 %v8861_v56 }
 0x20a   :  { %7986 = vmatprep.subr.bf16.mxu0 %v8867_v63 }
 0x20d   :  { %7988 = vmatpush3.bf16.msra.mxu0 %v8867_v63 }
 0x20e   :  { %7990 = vmatprep.subr.bf16.mxu0 %v8873_v6 }
 0x211   :  { %7992 = vmatpush3.bf16.msra.mxu0 %v8873_v6 }
 0x212   :  { %7994 = vmatprep.subr.bf16.mxu0 %v8891_v16 }
 0x215   :  { %7996 = vmatpush3.bf16.msra.mxu0 %v8891_v16 }
 0x216   :  { %8002 = vmatprep.subr.bf16.mxu0 %v8837_v28 }
 0x218   :  { %6922 = vmatmul.mubr.f32.vlgmr.msra.gmra.mrb[28].mxu0 %v1059_v41 }
 0x219   :  { %8004 = vmatpush3.bf16.msra.mxu0 %v8837_v28  ;;  %6924 = vmatprep.mubr.f32.mxu0 %v1060_v43  ;;  %v8033_v43 = vpack.c.bf16 %v1340_v39, %v1339_v38 }
 0x21a   :  { %8006 = vmatprep.subr.bf16.mxu0 %v8843_v35 }
 0x21c   :  { %6925 = vmatmul.mubr.f32.gmra.mrb[30].mxu0 %v1061_v44 }
 0x21d   :  { %8008 = vmatpush3.bf16.msra.mxu0 %v8843_v35  ;;  %6969 = vmatprep.mubr.f32.mxu0 %v1250_v45 }
 0x21e   :  { %8010 = vmatprep.subr.bf16.mxu0 %v8849_v42 }
 0x221   :  { %8012 = vmatpush3.bf16.msra.mxu0 %v8849_v42 }
 0x222   :  { %8014 = vmatprep.subr.bf16.mxu0 %v8855_v49 }
 0x225   :  { %8016 = vmatpush3.bf16.msra.mxu0 %v8855_v49 }
 0x226   :  { %8018 = vmatprep.subr.bf16.mxu0 %v8861_v56 }
 0x229   :  { %8020 = vmatpush3.bf16.msra.mxu0 %v8861_v56 }
 0x22a   :  { %8022 = vmatprep.subr.bf16.mxu0 %v8867_v63 }
 0x22d   :  { %8024 = vmatpush3.bf16.msra.mxu0 %v8867_v63 }
 0x22e   :  { %8026 = vmatprep.subr.bf16.mxu0 %v8873_v6 }
 0x231   :  { %8028 = vmatpush3.bf16.msra.mxu0 %v8873_v6 }
 0x232   :  { %8030 = vmatprep.subr.bf16.mxu0 %v8891_v16 }
 0x235   :  { %8032 = vmatpush3.bf16.msra.mxu0 %v8891_v16 }
 0x236   :  { %8074 = vmatprep.subr.bf16.mxu0 %v8837_v28 }
 0x238   :  { %6970 = vmatmul.mubr.f32.vlgmr.msra.gmra.mrb[32].mxu0 %v1251_v46  ;;  %v1442_v46 = vld [vmem:[%s9946_s2 + $0xc0] sm:$0xff] }
 0x239   :  { %8076 = vmatpush3.bf16.msra.mxu0 %v8837_v28  ;;  %6972 = vmatprep.mubr.f32.mxu0 %v1252_v47  ;;  %v1531_v47 = vld [vmem:[%s9947_s3 + $0x60] sm:$0xff] }
 0x23a   :  { %8078 = vmatprep.subr.bf16.mxu0 %v8843_v35 }
 0x23c   :  { %6973 = vmatmul.mubr.f32.gmra.mrb[34].mxu0 %v1253_v48  ;;  %v1532_v48 = vld [vmem:[%s9947_s3 + $0x68] sm:$0xff] }
 0x23d   :  { %8080 = vmatpush3.bf16.msra.mxu0 %v8843_v35  ;;  %7065 = vmatprep.mubr.f32.mxu0 %v1634_v50  ;;  %v8069_v50 = vpack.c.bf16 %v1532_v48, %v1531_v47  ;;  %v2405_v47 = vld [vmem:[%s9946_s2 + $0x178] sm:$0xff]  ;;  %v2683_v48 = vld [vmem:[%s9947_s3 + $0xc0] sm:$0xff] }
 0x23e   :  { %8082 = vmatprep.subr.bf16.mxu0 %v8849_v42 }
 0x241   :  { %8084 = vmatpush3.bf16.msra.mxu0 %v8849_v42 }
 0x242   :  { %8086 = vmatprep.subr.bf16.mxu0 %v8855_v49 }
 0x245   :  { %8088 = vmatpush3.bf16.msra.mxu0 %v8855_v49 }
 0x246   :  { %8090 = vmatprep.subr.bf16.mxu0 %v8861_v56 }
 0x249   :  { %8092 = vmatpush3.bf16.msra.mxu0 %v8861_v56 }
 0x24a   :  { %8094 = vmatprep.subr.bf16.mxu0 %v8867_v63 }
 0x24d   :  { %8096 = vmatpush3.bf16.msra.mxu0 %v8867_v63 }
 0x24e   :  { %8098 = vmatprep.subr.bf16.mxu0 %v8873_v6 }
 0x251   :  { %8100 = vmatpush3.bf16.msra.mxu0 %v8873_v6 }
 0x252   :  { %8102 = vmatprep.subr.bf16.mxu0 %v8891_v16 }
 0x255   :  { %8104 = vmatpush3.bf16.msra.mxu0 %v8891_v16 }
 0x256   :  { %8146 = vmatprep.subr.bf16.mxu0 %v8837_v28 }
 0x258   :  { %7066 = vmatmul.mubr.f32.vlgmr.msra.gmra.mrb[36].mxu0 %v1635_v53  ;;  %v1445_v53 = vld [vmem:[%s9946_s2 + $0xd8] sm:$0xff] }
 0x259   :  { %8148 = vmatpush3.bf16.msra.mxu0 %v8837_v28  ;;  %7068 = vmatprep.mubr.f32.mxu0 %v1636_v54  ;;  %v1723_v54 = vld [vmem:[%s9947_s3 + $0x70] sm:$0xff] }
 0x25a   :  { %8150 = vmatprep.subr.bf16.mxu0 %v8843_v35 }
 0x25c   :  { %7069 = vmatmul.mubr.f32.gmra.mrb[38].mxu0 %v1637_v55  ;;  %v1724_v55 = vld [vmem:[%s9947_s3 + $0x78] sm:$0xff] }
 0x25d   :  { %8152 = vmatpush3.bf16.msra.mxu0 %v8843_v35  ;;  %7161 = vmatprep.mubr.f32.mxu0 %v2018_v57  ;;  %v8105_v57 = vpack.c.bf16 %v1724_v55, %v1723_v54 }
 0x25e   :  { %8154 = vmatprep.subr.bf16.mxu0 %v8849_v42 }
 0x261   :  { %8156 = vmatpush3.bf16.msra.mxu0 %v8849_v42 }
 0x262   :  { %8158 = vmatprep.subr.bf16.mxu0 %v8855_v49 }
 0x265   :  { %8160 = vmatpush3.bf16.msra.mxu0 %v8855_v49 }
 0x266   :  { %8162 = vmatprep.subr.bf16.mxu0 %v8861_v56 }
 0x269   :  { %8164 = vmatpush3.bf16.msra.mxu0 %v8861_v56 }
 0x26a   :  { %8166 = vmatprep.subr.bf16.mxu0 %v8867_v63 }
 0x26d   :  { %8168 = vmatpush3.bf16.msra.mxu0 %v8867_v63 }
 0x26e   :  { %8170 = vmatprep.subr.bf16.mxu0 %v8873_v6 }
 0x271   :  { %8172 = vmatpush3.bf16.msra.mxu0 %v8873_v6 }
 0x272   :  { %8174 = vmatprep.subr.bf16.mxu0 %v8891_v16 }
 0x275   :  { %8176 = vmatpush3.bf16.msra.mxu0 %v8891_v16 }
 0x276   :  { %8182 = vmatprep.subr.bf16.mxu0 %v8837_v28 }
 0x278   :  { %7162 = vmatmul.mubr.f32.vlgmr.msra.gmra.mrb[40].mxu0 %v2019_v58 }
 0x279   :  { %8184 = vmatpush3.bf16.msra.mxu0 %v8837_v28  ;;  %7164 = vmatprep.mubr.f32.mxu0 %v2020_v59 }
 0x27a   :  { %8186 = vmatprep.subr.bf16.mxu0 %v8843_v35 }
 0x27c   :  { %7165 = vmatmul.mubr.f32.gmra.mrb[42].mxu0 %v2021_v60 }
 0x27d   :  { %8188 = vmatpush3.bf16.msra.mxu0 %v8843_v35  ;;  %7209 = vmatprep.mubr.f32.mxu0 %v2210_v61 }
 0x27e   :  { %8190 = vmatprep.subr.bf16.mxu0 %v8849_v42 }
 0x281   :  { %8192 = vmatpush3.bf16.msra.mxu0 %v8849_v42 }
 0x282   :  { %8194 = vmatprep.subr.bf16.mxu0 %v8855_v49 }
 0x285   :  { %8196 = vmatpush3.bf16.msra.mxu0 %v8855_v49 }
 0x286   :  { %8198 = vmatprep.subr.bf16.mxu0 %v8861_v56 }
 0x289   :  { %8200 = vmatpush3.bf16.msra.mxu0 %v8861_v56 }
 0x28a   :  { %8202 = vmatprep.subr.bf16.mxu0 %v8867_v63 }
 0x28d   :  { %8204 = vmatpush3.bf16.msra.mxu0 %v8867_v63 }
 0x28e   :  { %8206 = vmatprep.subr.bf16.mxu0 %v8873_v6 }
 0x291   :  { %8208 = vmatpush3.bf16.msra.mxu0 %v8873_v6 }
 0x292   :  { %8210 = vmatprep.subr.bf16.mxu0 %v8891_v16 }
 0x295   :  { %8212 = vmatpush3.bf16.msra.mxu0 %v8891_v16 }
 0x296   :  { %8254 = vmatprep.subr.bf16.mxu0 %v8837_v28 }
 0x298   :  { %7210 = vmatmul.mubr.f32.vlgmr.msra.gmra.mrb[44].mxu0 %v2211_v62 }
 0x299   :  { %8256 = vmatpush3.bf16.msra.mxu0 %v8837_v28  ;;  %7212 = vmatprep.mubr.f32.mxu0 %v2212_v0 }
 0x29a   :  { %8258 = vmatprep.subr.bf16.mxu0 %v8843_v35 }
 0x29c   :  { %7213 = vmatmul.mubr.f32.gmra.mrb[46].mxu0 %v2213_v1 }
 0x29d   :  { %8260 = vmatpush3.bf16.msra.mxu0 %v8843_v35  ;;  %7305 = vmatprep.mubr.f32.mxu0 %v2594_v2 }
 0x29e   :  { %8262 = vmatprep.subr.bf16.mxu0 %v8849_v42 }
 0x2a1   :  { %8264 = vmatpush3.bf16.msra.mxu0 %v8849_v42 }
 0x2a2   :  { %8266 = vmatprep.subr.bf16.mxu0 %v8855_v49 }
 0x2a5   :  { %8268 = vmatpush3.bf16.msra.mxu0 %v8855_v49 }
 0x2a6   :  { %8270 = vmatprep.subr.bf16.mxu0 %v8861_v56 }
 0x2a9   :  { %8272 = vmatpush3.bf16.msra.mxu0 %v8861_v56 }
 0x2aa   :  { %8274 = vmatprep.subr.bf16.mxu0 %v8867_v63 }
 0x2ab   :  { %v9112_v3 = vpop.f32.mrb[20].mxu0 }
 0x2ac   :  { %v9114_v4 = vpop.f32.mrb[21].mxu0 }
 0x2ad   :  { %8276 = vmatpush3.bf16.msra.mxu0 %v8867_v63 }
 0x2ae   :  { %8278 = vmatprep.subr.bf16.mxu0 %v8873_v6 }
 0x2af   :  { %v9118_v5 = vpop.f32.mrb[22].mxu0 }
 0x2b0   :  { %v9120_v7 = vpop.f32.mrb[23].mxu0 }
 0x2b1   :  { %8280 = vmatpush3.bf16.msra.mxu0 %v8873_v6 }
 0x2b2   :  { %8282 = vmatprep.subr.bf16.mxu0 %v8891_v16 }
 0x2b5   :  { %8284 = vmatpush3.bf16.msra.mxu0 %v8891_v16 }
 0x2b6   :  { %8290 = vmatprep.subr.bf16.mxu0 %v8837_v28 }
 0x2b8   :  { %7306 = vmatmul.mubr.f32.vlgmr.msra.gmra.mrb[48].mxu0 %v2595_v8 }
 0x2b9   :  { %8292 = vmatpush3.bf16.msra.mxu0 %v8837_v28  ;;  %7308 = vmatprep.mubr.f32.mxu0 %v2596_v9 }
 0x2ba   :  { %8294 = vmatprep.subr.bf16.mxu0 %v8843_v35 }
 0x2bc   :  { %7309 = vmatmul.mubr.f32.gmra.mrb[50].mxu0 %v2597_v10  ;;  %v1826_v10 = vld [vmem:[%s9946_s2 + $0x100] sm:$0xff] }
 0x2bd   :  { %8296 = vmatpush3.bf16.msra.mxu0 %v8843_v35  ;;  %7353 = vmatprep.mubr.f32.mxu0 %v2786_v11  ;;  %v1915_v11 = vld [vmem:[%s9947_s3 + $0x80] sm:$0xff] }
 0x2be   :  { %8298 = vmatprep.subr.bf16.mxu0 %v8849_v42 }
 0x2c1   :  { %8300 = vmatpush3.bf16.msra.mxu0 %v8849_v42 }
 0x2c2   :  { %8302 = vmatprep.subr.bf16.mxu0 %v8855_v49 }
 0x2c5   :  { %8304 = vmatpush3.bf16.msra.mxu0 %v8855_v49 }
 0x2c6   :  { %8306 = vmatprep.subr.bf16.mxu0 %v8861_v56 }
 0x2c9   :  { %8308 = vmatpush3.bf16.msra.mxu0 %v8861_v56 }
 0x2ca   :  { %8310 = vmatprep.subr.bf16.mxu0 %v8867_v63 }
 0x2cb   :  { %v6827_v12 = vpop.f32.mrb[24].mxu0 }
 0x2cc   :  { %v744_v13 = vpop.f32.mrb[25].mxu0 }
 0x2cd   :  { %6835 = vmatprep.mubr.msk.f32.mxu1 %vm56_vm0, %v744_v13  ;;  %8312 = vmatpush3.bf16.msra.mxu0 %v8867_v63 }
 0x2ce   :  { %6836 = vmatmul.mubr.msk.f32.vlgmr.msra.gmra.mrb[4].mxu1 %vm56_vm0, %v6827_v12  ;;  %8314 = vmatprep.subr.bf16.mxu0 %v8873_v6  ;;  %v1916_v12 = vld [vmem:[%s9947_s3 + $0x88] sm:$0xff] }
 0x2cf   :  { %7932 = vmatpush3.bf16.msra.mxu1 %v8837_v28  ;;  %v6830_v14 = vpop.f32.mrb[26].mxu0  ;;  %v8141_v13 = vpack.c.bf16 %v1916_v12, %v1915_v11  ;;  %v2978_v12 = vld [vmem:[%s9946_s2 + $0x1c0] sm:$0xff] }
 0x2d0   :  { %7934 = vmatprep.subr.bf16.mxu1 %v8843_v35  ;;  %v754_v15 = vpop.f32.mrb[27].mxu0 }
 0x2d1   :  { %8316 = vmatpush3.bf16.msra.mxu0 %v8873_v6  ;;  %6838 = vmatprep.mubr.msk.f32.mxu1 %vm56_vm0, %v754_v15  ;;  %v1828_v15 = vld [vmem:[%s9946_s2 + $0x110] sm:$0xff] }
 0x2d2   :  { %8318 = vmatprep.subr.bf16.mxu0 %v8891_v16  ;;  %6839 = vmatmul.mubr.msk.f32.gmra.mrb[6].mxu1 %vm56_vm0, %v6830_v14  ;;  %v1827_v14 = vld [vmem:[%s9946_s2 + $0x108] sm:$0xff] }
 0x2d3   :  { %7936 = vmatpush3.bf16.msra.mxu1 %v8843_v35  ;;  %6873 = vmatprep.mubr.f32.mxu1 %v866_v17  ;;  %v1829_v17 = vld [vmem:[%s9946_s2 + $0x118] sm:$0xff] }
 0x2d4   :  { %7938 = vmatprep.subr.bf16.mxu1 %v8849_v42 }
 0x2d5   :  { %8320 = vmatpush3.bf16.msra.mxu0 %v8891_v16 }
 0x2d6   :  { %8362 = vmatprep.subr.bf16.mxu0 %v8837_v28 }
 0x2d7   :  { %7940 = vmatpush3.bf16.msra.mxu1 %v8849_v42 }
 0x2d8   :  { %7942 = vmatprep.subr.bf16.mxu1 %v8855_v49  ;;  %7354 = vmatmul.mubr.f32.vlgmr.msra.gmra.mrb[52].mxu0 %v2787_v18  ;;  %v2107_v18 = vld [vmem:[%s9947_s3 + $0x90] sm:$0xff] }
 0x2d9   :  { %8364 = vmatpush3.bf16.msra.mxu0 %v8837_v28  ;;  %v8177_v20 = vpack.c.bf16 %v2108_v19, %v2107_v18  ;;  %7356 = vmatprep.mubr.f32.mxu0 %v2788_v27 }
 0x2da   :  { %8366 = vmatprep.subr.bf16.mxu0 %v8843_v35 }
 0x2db   :  { %7944 = vmatpush3.bf16.msra.mxu1 %v8855_v49 }
 0x2dc   :  { %7946 = vmatprep.subr.bf16.mxu1 %v8861_v56  ;;  %7357 = vmatmul.mubr.f32.gmra.mrb[54].mxu0 %v2789_v29 }
 0x2dd   :  { %8368 = vmatpush3.bf16.msra.mxu0 %v8843_v35 }
 0x2de   :  { %8370 = vmatprep.subr.bf16.mxu0 %v8849_v42 }
 0x2df   :  { %7948 = vmatpush3.bf16.msra.mxu1 %v8861_v56 }
 0x2e0   :  { %7950 = vmatprep.subr.bf16.mxu1 %v8867_v63 }
 0x2e1   :  { %8372 = vmatpush3.bf16.msra.mxu0 %v8849_v42 }
 0x2e2   :  { %8374 = vmatprep.subr.bf16.mxu0 %v8855_v49 }
 0x2e3   :  { %7952 = vmatpush3.bf16.msra.mxu1 %v8867_v63 }
 0x2e4   :  { %7954 = vmatprep.subr.bf16.mxu1 %v8873_v6 }
 0x2e5   :  { %8376 = vmatpush3.bf16.msra.mxu0 %v8855_v49 }
 0x2e6   :  { %8378 = vmatprep.subr.bf16.mxu0 %v8861_v56 }
 0x2e7   :  { %7956 = vmatpush3.bf16.msra.mxu1 %v8873_v6 }
 0x2e8   :  { %7958 = vmatprep.subr.bf16.mxu1 %v8891_v16 }
 0x2e9   :  { %8380 = vmatpush3.bf16.msra.mxu0 %v8861_v56 }
 0x2ea   :  { %8382 = vmatprep.subr.bf16.mxu0 %v8867_v63 }
 0x2eb   :  { %7960 = vmatpush3.bf16.msra.mxu1 %v8891_v16  ;;  %v6923_v23 = vpop.f32.mrb[28].mxu0 }
 0x2ec   :  { %v1128_v25 = vpop.f32.mrb[29].mxu0  ;;  %7962 = vmatprep.subr.bf16.mxu1 %v7961_v21 }
 0x2ed   :  { %8384 = vmatpush3.bf16.msra.mxu0 %v8867_v63 }
 0x2ee   :  { %6874 = vmatmul.mubr.f32.vlgmr.msra.gmra.mrb[8].mxu1 %v867_v22  ;;  %8386 = vmatprep.subr.bf16.mxu0 %v8873_v6 }
 0x2ef   :  { %6876 = vmatprep.mubr.f32.mxu1 %v868_v24  ;;  %7964 = vmatpush3.bf16.msra.mxu1 %v7961_v21  ;;  %v6926_v31 = vpop.f32.mrb[30].mxu0 }
 0x2f0   :  { %7998 = vmatprep.subr.bf16.mxu1 %v7997_v30  ;;  %v1138_v32 = vpop.f32.mrb[31].mxu0 }
 0x2f1   :  { %8388 = vmatpush3.bf16.msra.mxu0 %v8873_v6 }
 0x2f2   :  { %6877 = vmatmul.mubr.f32.gmra.mrb[10].mxu1 %v869_v26  ;;  %8390 = vmatprep.subr.bf16.mxu0 %v8891_v16 }
 0x2f5   :  { %8392 = vmatpush3.bf16.msra.mxu0 %v8891_v16 }
 0x30b   :  { %v6971_v33 = vpop.f32.mrb[32].mxu0 }
 0x30c   :  { %v1320_v34 = vpop.f32.mrb[33].mxu0 }
 0x30f   :  { %v6974_v36 = vpop.f32.mrb[34].mxu0 }
 0x310   :  { %v1330_v37 = vpop.f32.mrb[35].mxu0 }
 0x32b   :  { %v7067_v58 = vpop.f32.mrb[36].mxu0 }
 0x32c   :  { %v1704_v59 = vpop.f32.mrb[37].mxu0 }
 0x32f   :  { %v7070_v60 = vpop.f32.mrb[38].mxu0 }
 0x330   :  { %v1714_v61 = vpop.f32.mrb[39].mxu0 }
 0x34b   :  { %v9273_v62 = vpop.f32.mrb[40].mxu0 }
 0x34c   :  { %v9275_v0 = vpop.f32.mrb[41].mxu0 }
 0x34f   :  { %v7166_v21 = vpop.f32.mrb[42].mxu0 }
 0x350   :  { %v2098_v22 = vpop.f32.mrb[43].mxu0 }
 0x3c1   :  { %v6875_v40 = vpop.f32.mrb[8].mxu1 }
 0x3c2   :  { %v936_v41 = vpop.f32.mrb[9].mxu1 }
 0x3c3   :  { %6883 = vmatprep.mubr.msk.f32.mxu1 %vm56_vm0, %v936_v41  ;;  %v2491_v41 = vld [vmem:[%s9947_s3 + $0xb0] sm:$0xff] }
 0x3c4   :  { %6884 = vmatmul.mubr.msk.f32.vlgmr.msra.gmra.mrb[4].mxu1 %vm56_vm0, %v6875_v40  ;;  %v2402_v40 = vld [vmem:[%s9946_s2 + $0x160] sm:$0xff] }
 0x3c5   :  { %v6878_v44 = vpop.f32.mrb[10].mxu1  ;;  %8000 = vmatpush3.bf16.msra.mxu1 %v7997_v30 }
 0x3c6   :  { %v946_v45 = vpop.f32.mrb[11].mxu1  ;;  %8034 = vmatprep.subr.bf16.mxu1 %v8033_v43 }
 0x3c7   :  { %6886 = vmatprep.mubr.msk.f32.mxu1 %vm56_vm0, %v946_v45  ;;  %v2403_v45 = vld [vmem:[%s9946_s2 + $0x168] sm:$0xff] }
 0x3c8   :  { %6887 = vmatmul.mubr.msk.f32.gmra.mrb[6].mxu1 %vm56_vm0, %v6878_v44 }
 0x3c9   :  { %6931 = vmatprep.mubr.msk.f32.mxu1 %vm56_vm0, %v1128_v25 }
 0x3cc   :  { %6932 = vmatmul.mubr.msk.f32.vlgmr.msra.gmra.mrb[4].mxu1 %vm56_vm0, %v6923_v23  ;;  %v7211_v23 = vpop.f32.mrb[44].mxu0 }
 0x3cd   :  { %8036 = vmatpush3.bf16.msra.mxu1 %v8033_v43  ;;  %6934 = vmatprep.mubr.msk.f32.mxu1 %vm56_vm0, %v1138_v32  ;;  %v2280_v24 = vpop.f32.mrb[45].mxu0  ;;  %v2299_v32 = vld [vmem:[%s9947_s3 + $0xa0] sm:$0xff]  ;;  %v2492_v43 = vld [vmem:[%s9947_s3 + $0xb8] sm:$0xff] }
 0x3ce   :  { %8038 = vmatprep.subr.bf16.mxu1 %v8837_v28  ;;  %v7214_v25 = vpop.f32.mrb[46].mxu0  ;;  %v8249_v44 = vpack.c.bf16 %v2492_v43, %v2491_v41 }
 0x3cf   :  { %v2290_v26 = vpop.f32.mrb[47].mxu0 }
 0x3d0   :  { %6935 = vmatmul.mubr.msk.f32.gmra.mrb[6].mxu1 %vm56_vm0, %v6926_v31  ;;  %v9331_v30 = vpop.f32.mrb[48].mxu0 }
 0x3d1   :  { %6979 = vmatprep.mubr.msk.f32.mxu1 %vm56_vm0, %v1320_v34  ;;  %v9333_v31 = vpop.f32.mrb[49].mxu0 }
 0x3d4   :  { %6980 = vmatmul.mubr.msk.f32.vlgmr.msra.gmra.mrb[4].mxu1 %vm56_vm0, %v6971_v33  ;;  %v2300_v33 = vld [vmem:[%s9947_s3 + $0xa8] sm:$0xff] }
 0x3d5   :  { %8040 = vmatpush3.bf16.msra.mxu1 %v8837_v28  ;;  %6982 = vmatprep.mubr.msk.f32.mxu1 %vm56_vm0, %v1330_v37  ;;  %v8213_v37 = vpack.c.bf16 %v2300_v33, %v2299_v32 }
 0x3d6   :  { %8042 = vmatprep.subr.bf16.mxu1 %v8843_v35 }
 0x3d8   :  { %6983 = vmatmul.mubr.msk.f32.gmra.mrb[6].mxu1 %vm56_vm0, %v6974_v36 }
 0x3d9   :  { %8044 = vmatpush3.bf16.msra.mxu1 %v8843_v35  ;;  %7017 = vmatprep.mubr.f32.mxu1 %v1442_v46  ;;  %v2404_v46 = vld [vmem:[%s9946_s2 + $0x170] sm:$0xff] }
 0x3da   :  { %8046 = vmatprep.subr.bf16.mxu1 %v8849_v42 }
 0x3dd   :  { %8048 = vmatpush3.bf16.msra.mxu1 %v8849_v42 }
 0x3de   :  { %8050 = vmatprep.subr.bf16.mxu1 %v8855_v49 }
 0x3e1   :  { %8052 = vmatpush3.bf16.msra.mxu1 %v8855_v49 }
 0x3e2   :  { %8054 = vmatprep.subr.bf16.mxu1 %v8861_v56 }
 0x3e5   :  { %8056 = vmatpush3.bf16.msra.mxu1 %v8861_v56 }
 0x3e6   :  { %8058 = vmatprep.subr.bf16.mxu1 %v8867_v63 }
 0x3e9   :  { %8060 = vmatpush3.bf16.msra.mxu1 %v8867_v63 }
 0x3ea   :  { %8062 = vmatprep.subr.bf16.mxu1 %v8873_v6 }
 0x3ed   :  { %8064 = vmatpush3.bf16.msra.mxu1 %v8873_v6 }
 0x3ee   :  { %8066 = vmatprep.subr.bf16.mxu1 %v8891_v16 }
 0x3f1   :  { %8068 = vmatpush3.bf16.msra.mxu1 %v8891_v16 }
 0x3f2   :  { %8070 = vmatprep.subr.bf16.mxu1 %v8069_v50 }
 0x3f4   :  { %7018 = vmatmul.mubr.f32.vlgmr.msra.gmra.mrb[12].mxu1 %v1443_v51 }
 0x3f5   :  { %7020 = vmatprep.mubr.f32.mxu1 %v1444_v52  ;;  %8072 = vmatpush3.bf16.msra.mxu1 %v8069_v50  ;;  %v2684_v50 = vld [vmem:[%s9947_s3 + $0xc8] sm:$0xff]  ;;  %v7310_v52 = vpop.f32.mrb[50].mxu0 }
 0x3f6   :  { %8106 = vmatprep.subr.bf16.mxu1 %v8105_v57  ;;  %v8285_v51 = vpack.c.bf16 %v2684_v50, %v2683_v48 }
 0x3f8   :  { %7021 = vmatmul.mubr.f32.gmra.mrb[14].mxu1 %v1445_v53  ;;  %v2674_v53 = vpop.f32.mrb[51].mxu0 }
 0x3f9   :  { %v7355_v54 = vpop.f32.mrb[52].mxu0 }
 0x3fa   :  { %v2856_v55 = vpop.f32.mrb[53].mxu0 }
 0x4c7   :  { %v7019_v1 = vpop.f32.mrb[12].mxu1 }
 0x4c8   :  { %v1512_v2 = vpop.f32.mrb[13].mxu1 }
 0x4c9   :  { %7027 = vmatprep.mubr.msk.f32.mxu1 %vm56_vm0, %v1512_v2 }
 0x4ca   :  { %7028 = vmatmul.mubr.msk.f32.vlgmr.msra.gmra.mrb[4].mxu1 %vm56_vm0, %v7019_v1  ;;  %v2876_v1 = vld [vmem:[%s9947_s3 + $0xd8] sm:$0xff] }
 0x4cb   :  { %8108 = vmatpush3.bf16.msra.mxu1 %v8105_v57  ;;  %v7022_v8 = vpop.f32.mrb[14].mxu1  ;;  %v7358_v57 = vpop.f32.mrb[54].mxu0 }
 0x4cc   :  { %8110 = vmatprep.subr.bf16.mxu1 %v8837_v28  ;;  %v1522_v9 = vpop.f32.mrb[15].mxu1 }
 0x4cd   :  { %7030 = vmatprep.mubr.msk.f32.mxu1 %vm56_vm0, %v1522_v9 }
 0x4ce   :  { %7031 = vmatmul.mubr.msk.f32.gmra.mrb[6].mxu1 %vm56_vm0, %v7022_v8 }
 0x4cf   :  { %7075 = vmatprep.mubr.msk.f32.mxu1 %vm56_vm0, %v1704_v59  ;;  %v3170_v59 = vld [vmem:[%s9946_s2 + $0x1e0] sm:$0xff] }
 0x4d0   :  { %7449 = vmatprep.mubr.f32.mxu0 %v3170_v59 }
 0x4d2   :  { %7076 = vmatmul.mubr.msk.f32.vlgmr.msra.gmra.mrb[4].mxu1 %vm56_vm0, %v7067_v58  ;;  %v2866_v58 = vpop.f32.mrb[55].mxu0 }
 0x4d3   :  { %8112 = vmatpush3.bf16.msra.mxu1 %v8837_v28  ;;  %7078 = vmatprep.mubr.msk.f32.mxu1 %vm56_vm0, %v1714_v61  ;;  %v3172_v61 = vld [vmem:[%s9946_s2 + $0x1f0] sm:$0xff] }
 0x4d4   :  { %8114 = vmatprep.subr.bf16.mxu1 %v8843_v35 }
 0x4d6   :  { %7079 = vmatmul.mubr.msk.f32.gmra.mrb[6].mxu1 %vm56_vm0, %v7070_v60  ;;  %v3171_v60 = vld [vmem:[%s9946_s2 + $0x1e8] sm:$0xff] }
 0x4d7   :  { %8116 = vmatpush3.bf16.msra.mxu1 %v8843_v35  ;;  %7113 = vmatprep.mubr.f32.mxu1 %v1826_v10 }
 0x4d8   :  { %8118 = vmatprep.subr.bf16.mxu1 %v8849_v42  ;;  %7450 = vmatmul.mubr.f32.vlgmr.msra.gmra.mrb[56].mxu0 %v3171_v60 }
 0x4d9   :  { %7452 = vmatprep.mubr.f32.mxu0 %v3172_v61 }
 0x4db   :  { %8120 = vmatpush3.bf16.msra.mxu1 %v8849_v42 }
 0x4dc   :  { %8122 = vmatprep.subr.bf16.mxu1 %v8855_v49 }
 0x4df   :  { %8124 = vmatpush3.bf16.msra.mxu1 %v8855_v49 }
 0x4e0   :  { %8126 = vmatprep.subr.bf16.mxu1 %v8861_v56 }
 0x4e3   :  { %8128 = vmatpush3.bf16.msra.mxu1 %v8861_v56 }
 0x4e4   :  { %8130 = vmatprep.subr.bf16.mxu1 %v8867_v63 }
 0x4e7   :  { %8132 = vmatpush3.bf16.msra.mxu1 %v8867_v63 }
 0x4e8   :  { %8134 = vmatprep.subr.bf16.mxu1 %v8873_v6 }
 0x4eb   :  { %8136 = vmatpush3.bf16.msra.mxu1 %v8873_v6 }
 0x4ec   :  { %8138 = vmatprep.subr.bf16.mxu1 %v8891_v16 }
 0x4ef   :  { %8140 = vmatpush3.bf16.msra.mxu1 %v8891_v16 }
 0x4f0   :  { %8142 = vmatprep.subr.bf16.mxu1 %v8141_v13 }
 0x4f2   :  { %7114 = vmatmul.mubr.f32.vlgmr.msra.gmra.mrb[16].mxu1 %v1827_v14 }
 0x4f3   :  { %7116 = vmatprep.mubr.f32.mxu1 %v1828_v15  ;;  %8144 = vmatpush3.bf16.msra.mxu1 %v8141_v13 }
 0x4f4   :  { %8178 = vmatprep.subr.bf16.mxu1 %v8177_v20 }
 0x4f6   :  { %7117 = vmatmul.mubr.f32.gmra.mrb[18].mxu1 %v1829_v17 }
 0x5ab   :  { %v7451_v14 = vpop.f32.mrb[56].mxu0 }
 0x5ac   :  { %v3240_v15 = vpop.f32.mrb[57].mxu0 }
 0x5c5   :  { %v7115_v34 = vpop.f32.mrb[16].mxu1 }
 0x5c6   :  { %v1896_v36 = vpop.f32.mrb[17].mxu1 }
 0x5c7   :  { %7123 = vmatprep.mubr.msk.f32.mxu1 %vm56_vm0, %v1896_v36 }
 0x5c8   :  { %7124 = vmatmul.mubr.msk.f32.vlgmr.msra.gmra.mrb[4].mxu1 %vm56_vm0, %v7115_v34 }
 0x5c9   :  { %v7118_v38 = vpop.f32.mrb[18].mxu1  ;;  %8180 = vmatpush3.bf16.msra.mxu1 %v8177_v20 }
 0x5ca   :  { %v1906_v39 = vpop.f32.mrb[19].mxu1  ;;  %8214 = vmatprep.subr.bf16.mxu1 %v8213_v37 }
 0x5cb   :  { %7126 = vmatprep.mubr.msk.f32.mxu1 %vm56_vm0, %v1906_v39 }
 0x5cc   :  { %7127 = vmatmul.mubr.msk.f32.gmra.mrb[6].mxu1 %vm56_vm0, %v7118_v38 }
 0x5cd   :  { %7171 = vmatprep.mubr.msk.f32.mxu1 %vm56_vm0, %v9275_v0  ;;  %v2875_v0 = vld [vmem:[%s9947_s3 + $0xd0] sm:$0xff] }
 0x5ce   :  { %v8321_v9 = vpack.c.bf16 %v2876_v1, %v2875_v0 }
 0x5d0   :  { %7172 = vmatmul.mubr.msk.f32.vlgmr.msra.gmra.mrb[4].mxu1 %vm56_vm0, %v9273_v62  ;;  %v3173_v62 = vld [vmem:[%s9946_s2 + $0x1f8] sm:$0xff] }
 0x5d1   :  { %8216 = vmatpush3.bf16.msra.mxu1 %v8213_v37  ;;  %7174 = vmatprep.mubr.msk.f32.mxu1 %vm56_vm0, %v2098_v22 }
 0x5d2   :  { %8218 = vmatprep.subr.bf16.mxu1 %v8837_v28  ;;  %7453 = vmatmul.mubr.f32.gmra.mrb[58].mxu0 %v3173_v62 }
 0x5d4   :  { %7175 = vmatmul.mubr.msk.f32.gmra.mrb[6].mxu1 %vm56_vm0, %v7166_v21 }
 0x5d5   :  { %7219 = vmatprep.mubr.msk.f32.mxu1 %vm56_vm0, %v2280_v24  ;;  %v8700_v24 = vmov 0.0  }
 0x5d6   :  { %7484 = vmatprep.mubr.msk.f32.mxu0 %vm8699_vm2, %v8700_v24 }
 0x5d8   :  { %7220 = vmatmul.mubr.msk.f32.vlgmr.msra.gmra.mrb[4].mxu1 %vm56_vm0, %v7211_v23  ;;  %v8698_v23 = vmov 0.0|0.0  }
 0x5d9   :  { %8220 = vmatpush3.bf16.msra.mxu1 %v8837_v28  ;;  %7222 = vmatprep.mubr.msk.f32.mxu1 %vm56_vm0, %v2290_v26 }
 0x5da   :  { %8222 = vmatprep.subr.bf16.mxu1 %v8843_v35  ;;  %8403 = vmatprep.subr.bf16.mxu0 %v8698_v23 }
 0x5dc   :  { %7223 = vmatmul.mubr.msk.f32.gmra.mrb[6].mxu1 %vm56_vm0, %v7214_v25 }
 0x5dd   :  { %8224 = vmatpush3.bf16.msra.mxu1 %v8843_v35  ;;  %7257 = vmatprep.mubr.f32.mxu1 %v2402_v40 }
 0x5de   :  { %8226 = vmatprep.subr.bf16.mxu1 %v8849_v42 }
 0x5e1   :  { %8228 = vmatpush3.bf16.msra.mxu1 %v8849_v42 }
 0x5e2   :  { %8230 = vmatprep.subr.bf16.mxu1 %v8855_v49 }
 0x5e5   :  { %8232 = vmatpush3.bf16.msra.mxu1 %v8855_v49 }
 0x5e6   :  { %8234 = vmatprep.subr.bf16.mxu1 %v8861_v56 }
 0x5e9   :  { %8236 = vmatpush3.bf16.msra.mxu1 %v8861_v56 }
 0x5ea   :  { %8238 = vmatprep.subr.bf16.mxu1 %v8867_v63 }
 0x5ed   :  { %8240 = vmatpush3.bf16.msra.mxu1 %v8867_v63 }
 0x5ee   :  { %8242 = vmatprep.subr.bf16.mxu1 %v8873_v6 }
 0x5f1   :  { %8244 = vmatpush3.bf16.msra.mxu1 %v8873_v6 }
 0x5f2   :  { %8246 = vmatprep.subr.bf16.mxu1 %v8891_v16 }
 0x5f5   :  { %8248 = vmatpush3.bf16.msra.mxu1 %v8891_v16 }
 0x5f6   :  { %8250 = vmatprep.subr.bf16.mxu1 %v8249_v44 }
 0x5f8   :  { %7258 = vmatmul.mubr.f32.vlgmr.msra.gmra.mrb[20].mxu1 %v2403_v45 }
 0x5f9   :  { %7260 = vmatprep.mubr.f32.mxu1 %v2404_v46  ;;  %8252 = vmatpush3.bf16.msra.mxu1 %v8249_v44 }
 0x5fa   :  { %8286 = vmatprep.subr.bf16.mxu1 %v8285_v51 }
 0x5fc   :  { %7261 = vmatmul.mubr.f32.gmra.mrb[22].mxu1 %v2405_v47 }
 0x6a5   :  { %v7454_v17 = vpop.f32.mrb[58].mxu0 }
 0x6a6   :  { %v3250_v18 = vpop.f32.mrb[59].mxu0 }
 0x6cb   :  { %v7259_v2 = vpop.f32.mrb[20].mxu1 }
 0x6cc   :  { %v2472_v8 = vpop.f32.mrb[21].mxu1 }
 0x6cd   :  { %7267 = vmatprep.mubr.msk.f32.mxu1 %vm56_vm0, %v2472_v8 }
 0x6ce   :  { %7268 = vmatmul.mubr.msk.f32.vlgmr.msra.gmra.mrb[4].mxu1 %vm56_vm0, %v7259_v2 }
 0x6cf   :  { %v7262_v10 = vpop.f32.mrb[22].mxu1  ;;  %8288 = vmatpush3.bf16.msra.mxu1 %v8285_v51 }
 0x6d0   :  { %v2482_v11 = vpop.f32.mrb[23].mxu1  ;;  %8322 = vmatprep.subr.bf16.mxu1 %v8321_v9 }
 0x6d1   :  { %7270 = vmatprep.mubr.msk.f32.mxu1 %vm56_vm0, %v2482_v11 }
 0x6d2   :  { %7271 = vmatmul.mubr.msk.f32.gmra.mrb[6].mxu1 %vm56_vm0, %v7262_v10 }
 0x6d3   :  { %7315 = vmatprep.mubr.msk.f32.mxu1 %vm56_vm0, %v9333_v31 }
 0x6d6   :  { %7316 = vmatmul.mubr.msk.f32.vlgmr.msra.gmra.mrb[4].mxu1 %vm56_vm0, %v9331_v30 }
 0x6d7   :  { %8324 = vmatpush3.bf16.msra.mxu1 %v8321_v9  ;;  %7318 = vmatprep.mubr.msk.f32.mxu1 %vm56_vm0, %v2674_v53 }
 0x6d8   :  { %8326 = vmatprep.subr.bf16.mxu1 %v8837_v28 }
 0x6da   :  { %7319 = vmatmul.mubr.msk.f32.gmra.mrb[6].mxu1 %vm56_vm0, %v7310_v52 }
 0x6db   :  { %7363 = vmatprep.mubr.msk.f32.mxu1 %vm56_vm0, %v2856_v55 }
 0x6de   :  { %7364 = vmatmul.mubr.msk.f32.vlgmr.msra.gmra.mrb[4].mxu1 %vm56_vm0, %v7355_v54 }
 0x6df   :  { %8328 = vmatpush3.bf16.msra.mxu1 %v8837_v28  ;;  %7366 = vmatprep.mubr.msk.f32.mxu1 %vm56_vm0, %v2866_v58  ;;  %v3067_v28 = vld [vmem:[%s9947_s3 + $0xe0] sm:$0xff] }
 0x6e0   :  { %8330 = vmatprep.subr.bf16.mxu1 %v8843_v35 }
 0x6e2   :  { %7367 = vmatmul.mubr.msk.f32.gmra.mrb[6].mxu1 %vm56_vm0, %v7358_v57 }
 0x6e3   :  { %8332 = vmatpush3.bf16.msra.mxu1 %v8843_v35  ;;  %7401 = vmatprep.mubr.f32.mxu1 %v2978_v12  ;;  %v3068_v35 = vld [vmem:[%s9947_s3 + $0xe8] sm:$0xff] }
 0x6e4   :  { %8334 = vmatprep.subr.bf16.mxu1 %v8849_v42 }
 0x6e7   :  { %8336 = vmatpush3.bf16.msra.mxu1 %v8849_v42  ;;  %v8357_v42 = vpack.c.bf16 %v3068_v35, %v3067_v28  ;;  %v6039_v35 = vld [vmem:[%s9948_s4] ss:$0 sm:$0xff] }
 0x6e8   :  { %8338 = vmatprep.subr.bf16.mxu1 %v8855_v49 }
 0x6eb   :  { %8340 = vmatpush3.bf16.msra.mxu1 %v8855_v49  ;;  %v2979_v49 = vld [vmem:[%s9946_s2 + $0x1c8] sm:$0xff] }
 0x6ec   :  { %8342 = vmatprep.subr.bf16.mxu1 %v8861_v56 }
 0x6ef   :  { %8344 = vmatpush3.bf16.msra.mxu1 %v8861_v56  ;;  %v2980_v56 = vld [vmem:[%s9946_s2 + $0x1d0] sm:$0xff] }
 0x6f0   :  { %8346 = vmatprep.subr.bf16.mxu1 %v8867_v63 }
 0x6f3   :  { %8348 = vmatpush3.bf16.msra.mxu1 %v8867_v63  ;;  %v2981_v63 = vld [vmem:[%s9946_s2 + $0x1d8] sm:$0xff] }
 0x6f4   :  { %8350 = vmatprep.subr.bf16.mxu1 %v8873_v6 }
 0x6f7   :  { %8352 = vmatpush3.bf16.msra.mxu1 %v8873_v6  ;;  %v3259_v6 = vld [vmem:[%s9947_s3 + $0xf0] sm:$0xff] }
 0x6f8   :  { %8354 = vmatprep.subr.bf16.mxu1 %v8891_v16 }
 0x6fb   :  { %8356 = vmatpush3.bf16.msra.mxu1 %v8891_v16  ;;  %v3260_v16 = vld [vmem:[%s9947_s3 + $0xf8] sm:$0xff] }
 0x6fc   :  { %8358 = vmatprep.subr.bf16.mxu1 %v8357_v42  ;;  %v8393_v13 = vpack.c.bf16 %v3260_v16, %v3259_v6  ;;  %v6040_v6 = vld [vmem:[%s9949_s5] ss:$0 sm:$0xff] }
 0x6fe   :  { %7402 = vmatmul.mubr.f32.vlgmr.msra.gmra.mrb[24].mxu1 %v2979_v49 }
 0x6ff   :  { %7404 = vmatprep.mubr.f32.mxu1 %v2980_v56  ;;  %8360 = vmatpush3.bf16.msra.mxu1 %v8357_v42 }
 0x700   :  { %8394 = vmatprep.subr.bf16.mxu1 %v8393_v13 }
 0x702   :  { %7405 = vmatmul.mubr.f32.gmra.mrb[26].mxu1 %v2981_v63 }
 0x7d1   :  { %v7403_v19 = vpop.f32.mrb[24].mxu1 }
 0x7d2   :  { %v3048_v20 = vpop.f32.mrb[25].mxu1 }
 0x7d3   :  { %7411 = vmatprep.mubr.msk.f32.mxu1 %vm56_vm0, %v3048_v20 }
 0x7d4   :  { %7412 = vmatmul.mubr.msk.f32.vlgmr.msra.gmra.mrb[4].mxu1 %vm56_vm0, %v7403_v19 }
 0x7d5   :  { %v7406_v21 = vpop.f32.mrb[26].mxu1  ;;  %8396 = vmatpush3.bf16.msra.mxu1 %v8393_v13 }
 0x7d6   :  { %v3058_v22 = vpop.f32.mrb[27].mxu1  ;;  %8397 = vmatprep.subr.bf16.mxu1 %v8698_v23 }
 0x7d7   :  { %7414 = vmatprep.mubr.msk.f32.mxu1 %vm56_vm0, %v3058_v22 }
 0x7d8   :  { %7415 = vmatmul.mubr.msk.f32.gmra.mrb[6].mxu1 %vm56_vm0, %v7406_v21 }
 0x7d9   :  { %7459 = vmatprep.mubr.msk.f32.mxu1 %vm56_vm0, %v3240_v15 }
 0x7dc   :  { %7460 = vmatmul.mubr.msk.f32.vlgmr.msra.gmra.mrb[4].mxu1 %vm56_vm0, %v7451_v14 }
 0x7dd   :  { %7462 = vmatprep.mubr.msk.f32.mxu1 %vm56_vm0, %v3250_v18 }
 0x7e0   :  { %7463 = vmatmul.mubr.msk.f32.gmra.mrb[6].mxu1 %vm56_vm0, %v7454_v17 }
 0x7e1   :  { %7473 = vmatprep.mubr.msk.f32.mxu1 %vm8699_vm2, %v8700_v24 }
 0x8af   :  { %v7461_v25 = vpop.f32.mrb[4].mxu1 }
 0x8b0   :  { %v8589_v26 = vadd.f32 %v7461_v25, %v9112_v3  ;;  %v3339_v27 = vpop.f32.mrb[5].mxu1 }
 0x8b1   :  { %v8590_v29 = vadd.f32 %v3339_v27, %v9114_v4 }
 0x8b2   :  { %v3366_v30 = vsel %vm3364_vm3, %v8589_v26, 0.0 }
 0x8b3   :  { %v3365_v31 = vsel %vm3364_vm3, %v8590_v29, 0.0  ;;  %v7464_v32 = vpop.f32.mrb[6].mxu1 }
 0x8b4   :  { %v3367_v33 = vadd.f32 %v3366_v30, %v3365_v31  ;;  %v8591_v34 = vadd.f32 %v7464_v32, %v9118_v5  ;;  %v3349_v36 = vpop.f32.mrb[7].mxu1 }
 0x8b5   :  { %v8592_v37 = vadd.f32 %v3349_v36, %v9120_v7  ;;  %v3593_v36 = vld [vmem:[%s9950_s7 + $0x28] sm:$0xff] }
 0x8b6   :  { %v3370_v40 = vsel %vm3364_vm3, %v8591_v34, 0.0 }
 0x8b7   :  { %v3368_v38 = vsel %vm3364_vm3, %v8592_v37, 0.0 }
 0x8b8   :  { %v3369_v39 = vadd.f32 %v3368_v38, %v3367_v33  ;;  %v3440_v38 = vld [vmem:[%s9951_s6] sm:$0xff] }
 0x8ba   :  { %v3371_v3 = vadd.f32 %v3370_v40, %v3369_v39  ;;  %v3594_v40 = vld [vmem:[%s9950_s7 + $0x30] sm:$0xff] }
 0x8bc   :  { %v3372_v41 = vrot.slane %v3371_v3, 4 }
 0x8be   :  { %v3373_v43 = vadd.f32 %v3372_v41, %v3371_v3  ;;  %v3595_v3 = vld [vmem:[%s9950_s7 + $0x38] sm:$0xff] }
 0x8bf   :  { %v8413_v41 = vpack.c.bf16 %v3595_v3, %v3594_v40  ;;  %v4426_v40 = vld [vmem:[%s9950_s7 + $0xd0] sm:$0xff]  ;;  %v4427_v3 = vld [vmem:[%s9950_s7 + $0xd8] sm:$0xff] }
 0x8c0   :  { %v3374_v4 = vrot.slane %v3373_v43, 2 }
 0x8c2   :  { %v3375_v44 = vadd.f32 %v3374_v4, %v3373_v43  ;;  %v3742_v43 = vld [vmem:[%s9951_s6 + $0x10] sm:$0xff]  ;;  %v3894_v4 = vld [vmem:[%s9951_s6 + $0x18] sm:$0xff] }
 0x8c4   :  { %v3376_v45 = vrot.slane %v3375_v44, 1 }
 0x8c6   :  { %v3377_v46 = vadd.f32 %v3376_v45, %v3375_v44  ;;  %v4046_v44 = vld [vmem:[%s9951_s6 + $0x20] sm:$0xff]  ;;  %v4198_v45 = vld [vmem:[%s9951_s6 + $0x28] sm:$0xff] }
 0x8c8   :  { %v3379_v47 = vmul.f32 0.03125, %v3377_v46  ;;  %v4350_v46 = vld [vmem:[%s9951_s6 + $0x30] sm:$0xff] }
 0x8ca   :  { %v3380_v48 = vsub.f32 %v8590_v29, %v3379_v47  ;;  %v3381_v50 = vsub.f32 %v8589_v26, %v3379_v47  ;;  %v3382_v51 = vsub.f32 %v8592_v37, %v3379_v47  ;;  %v3383_v5 = vsub.f32 %v8591_v34, %v3379_v47  ;;  %v3592_v34 = vld [vmem:[%s9950_s7 + $0x20] sm:$0xff]  ;;  %v3518_v37 = vld [vmem:[%s9951_s6 + $0x8] sm:$0xff]  ;;  %v4502_v47 = vld [vmem:[%s9951_s6 + $0x38] sm:$0xff] }
 0x8cb   :  { %v8410_v39 = vpack.c.bf16 %v3593_v36, %v3592_v34 }
 0x8cc   :  { %v3384_v52 = vmul.f32 %v3380_v48, %v3380_v48  ;;  %v3385_v53 = vmul.f32 %v3381_v50, %v3381_v50  ;;  %v3386_v7 = vmul.f32 %v3382_v51, %v3382_v51  ;;  %v3387_v54 = vmul.f32 %v3383_v5, %v3383_v5 }
 0x8ce   :  { %v3388_v55 = vsel %vm3364_vm3, %v3384_v52, 0.0  ;;  %v3389_v57 = vsel %vm3364_vm3, %v3385_v53, 0.0  ;;  %v3391_v59 = vsel %vm3364_vm3, %v3386_v7, 0.0  ;;  %v3393_v61 = vsel %vm3364_vm3, %v3387_v54, 0.0  ;;  %v5262_v52 = vld [vmem:[%s9951_s6 + $0x60] sm:$0xff]  ;;  %v5414_v53 = vld [vmem:[%s9951_s6 + $0x68] sm:$0xff] }
 0x8cf   :  { %v3390_v58 = vadd.f32 %v3389_v57, %v3388_v55  ;;  %v5566_v7 = vld [vmem:[%s9951_s6 + $0x70] sm:$0xff]  ;;  %v5718_v54 = vld [vmem:[%s9951_s6 + $0x78] sm:$0xff]  ;;  %v3514_v55 = vld [vmem:[%s9950_s7] sm:$0xff] }
 0x8d0   :  { %v3515_v57 = vld [vmem:[%s9950_s7 + $0x8] sm:$0xff] }
 0x8d1   :  { %v3392_v60 = vadd.f32 %v3391_v59, %v3390_v58  ;;  %v8416_v58 = vpack.c.bf16 %v3515_v57, %v3514_v55  ;;  %v3516_v59 = vld [vmem:[%s9950_s7 + $0x10] sm:$0xff]  ;;  %v4731_v55 = vld [vmem:[%s9950_s7 + $0x118] sm:$0xff] }
 0x8d3   :  { %v3394_v62 = vadd.f32 %v3393_v61, %v3392_v60  ;;  %v3517_v60 = vld [vmem:[%s9950_s7 + $0x18] sm:$0xff] }
 0x8d5   :  { %v3395_v0 = vrot.slane %v3394_v62, 4 }
 0x8d7   :  { %v3396_v1 = vadd.f32 %v3395_v0, %v3394_v62 }
 0x8d9   :  { %v3397_v2 = vrot.slane %v3396_v1, 2 }
 0x8db   :  { %v3398_v8 = vadd.f32 %v3397_v2, %v3396_v1  ;;  %v8419_v2 = vpack.c.bf16 %v3517_v60, %v3516_v59  ;;  %v4880_v60 = vld [vmem:[%s9950_s7 + $0x120] sm:$0xff] }
 0x8dd   :  { %v3399_v9 = vrot.slane %v3398_v8, 1 }
 0x8df   :  { %v3400_v10 = vadd.f32 %v3399_v9, %v3398_v8  ;;  %v3816_v8 = vld [vmem:[%s9950_s7 + $0x40] sm:$0xff]  ;;  %v3817_v9 = vld [vmem:[%s9950_s7 + $0x48] sm:$0xff] }
 0x8e1   :  { %v3401_v11 = vmul.f32 0.03125, %v3400_v10  ;;  %v8428_v10 = vpack.c.bf16 %v3817_v9, %v3816_v8 }
 0x8e3   :  { %v3402_v12 = vadd.f32 1e-05, %v3401_v11  ;;  %v3818_v11 = vld [vmem:[%s9950_s7 + $0x50] sm:$0xff] }
 0x8e5   :  { %8686 = vrsqrt.f32 %v3402_v12  ;;  %v3819_v12 = vld [vmem:[%s9950_s7 + $0x58] sm:$0xff] }
 0x8ef   :  { %v8687_v28 = vpop.eup %8686 }
 0x8f0   :  { %v3404_v42 = vmul.f32 %v8687_v28, %v3380_v48  ;;  %v3405_v49 = vmul.f32 %v8687_v28, %v3381_v50  ;;  %v3406_v56 = vmul.f32 %v8687_v28, %v3382_v51  ;;  %v3407_v63 = vmul.f32 %v8687_v28, %v3383_v5  ;;  %v4654_v48 = vld [vmem:[%s9951_s6 + $0x40] sm:$0xff]  ;;  %v4806_v50 = vld [vmem:[%s9951_s6 + $0x48] sm:$0xff]  ;;  %v4958_v51 = vld [vmem:[%s9951_s6 + $0x50] sm:$0xff] }
 0x8f1   :  { %v5110_v5 = vld [vmem:[%s9951_s6 + $0x58] sm:$0xff] }
 0x8f2   :  { %v3414_v16 = vmul.f32 %v6039_v35, %v3404_v42  ;;  %v3415_v13 = vmul.f32 %v6039_v35, %v3405_v49  ;;  %v3416_v14 = vmul.f32 %v6039_v35, %v3406_v56  ;;  %v3417_v15 = vmul.f32 %v6039_v35, %v3407_v63  ;;  %v3968_v49 = vld [vmem:[%s9950_s7 + $0x60] sm:$0xff]  ;;  %v3969_v56 = vld [vmem:[%s9950_s7 + $0x68] sm:$0xff] }
 0x8f3   :  { %v8431_v42 = vpack.c.bf16 %v3819_v12, %v3818_v11  ;;  %v8440_v63 = vpack.c.bf16 %v3969_v56, %v3968_v49  ;;  %v5033_v11 = vld [vmem:[%s9950_s7 + $0x148] sm:$0xff] }
 0x8f4   :  { %v3424_v17 = vadd.f32 %v6040_v6, %v3414_v16  ;;  %v3425_v18 = vadd.f32 %v6040_v6, %v3415_v13  ;;  %v3426_v19 = vadd.f32 %v6040_v6, %v3416_v14  ;;  %v3427_v20 = vadd.f32 %v6040_v6, %v3417_v15  ;;  %v3970_v6 = vld [vmem:[%s9950_s7 + $0x70] sm:$0xff]  ;;  %v3971_v16 = vld [vmem:[%s9950_s7 + $0x78] sm:$0xff] }
 0x8f5   :  { %v8443_v15 = vpack.c.bf16 %v3971_v16, %v3970_v6  ;;  %v5185_v6 = vld [vmem:[%s9950_s7 + $0x168] sm:$0xff] }
 0x8f6   :  { %vm3428_vm0 = vcmp.gt.f32.partialorder %v3424_v17, 0.0  ;;  %vm3429_vm4 = vcmp.gt.f32.partialorder %v3425_v18, 0.0  ;;  %vm3430_vm5 = vcmp.gt.f32.partialorder %v3426_v19, 0.0  ;;  %vm3431_vm6 = vcmp.gt.f32.partialorder %v3427_v20, 0.0 }
 0x8f7   :  { %v3432_v21 = vmul.f32 0.2, %v3424_v17  ;;  %v3433_v22 = vmul.f32 0.2, %v3425_v18  ;;  %v3434_v25 = vmul.f32 0.2, %v3426_v19 }
 0x8f8   :  { %v3435_v26 = vmul.f32 0.2, %v3427_v20 }
 0x8f9   :  { %v3436_v27 = vsel %vm3428_vm0, %v3424_v17, %v3432_v21  ;;  %v3437_v29 = vsel %vm3429_vm4, %v3425_v18, %v3433_v22  ;;  %v3438_v30 = vsel %vm3430_vm5, %v3426_v19, %v3434_v25  ;;  %v4120_v17 = vld [vmem:[%s9950_s7 + $0x80] sm:$0xff]  ;;  %v4121_v18 = vld [vmem:[%s9950_s7 + $0x88] sm:$0xff]  ;;  %v4123_v21 = vld [vmem:[%s9950_s7 + $0x98] sm:$0xff] }
 0x8fa   :  { %v3439_v31 = vsel %vm3431_vm6, %v3427_v20, %v3435_v26  ;;  %v9499_v32 = vpack.c.bf16 %v3437_v29, %v3436_v27  ;;  %v8452_v19 = vpack.c.bf16 %v4121_v18, %v4120_v17  ;;  %v4122_v20 = vld [vmem:[%s9950_s7 + $0x90] sm:$0xff]  ;;  %v4272_v27 = vld [vmem:[%s9950_s7 + $0xa0] sm:$0xff]  ;;  %v4273_v29 = vld [vmem:[%s9950_s7 + $0xa8] sm:$0xff] }
 0x8fb   :  { %v9501_v33 = vpack.c.bf16 %v3439_v31, %v3438_v30  ;;  %v8455_v26 = vpack.c.bf16 %v4123_v21, %v4122_v20  ;;  %v8464_v30 = vpack.c.bf16 %v4273_v29, %v4272_v27  ;;  %v4274_v31 = vld [vmem:[%s9950_s7 + $0xb0] sm:$0xff]  ;;  %v5337_v20 = vld [vmem:[%s9950_s7 + $0x188] sm:$0xff] }
 0x8fc   :  { %8399 = vmatpush3.bf16.msra.mxu1 %v9499_v32  ;;  %8405 = vmatpush3.bf16.msra.mxu0 %v9499_v32 }
 0x8fd   :  { %8400 = vmatprep.subr.bf16.mxu1 %v8698_v23  ;;  %8406 = vmatprep.subr.bf16.mxu0 %v8698_v23 }
 0x900   :  { %8402 = vmatpush3.bf16.msra.mxu1 %v9501_v33  ;;  %8408 = vmatpush3.bf16.msra.mxu0 %v9501_v33 }
 0x901   :  { %8421 = vmatprep.subr.bf16.mxu0 %v8698_v23  ;;  %8409 = vmatprep.subr.bf16.mxu1 %v8698_v23 }
 0x903   :  { %7485 = vmatmul.mubr.msk.f32.vlgmr.msra.gmra.mrb[60].mxu0 %vm3364_vm3, %v3518_v37  ;;  %7474 = vmatmul.mubr.msk.f32.vlgmr.msra.gmra.mrb[28].mxu1 %vm3364_vm3, %v3440_v38  ;;  %v4424_v37 = vld [vmem:[%s9950_s7 + $0xc0] sm:$0xff]  ;;  %v4425_v38 = vld [vmem:[%s9950_s7 + $0xc8] sm:$0xff] }
 0x904   :  { %8423 = vmatpush3.bf16.msra.mxu0 %v9499_v32  ;;  %7517 = vmatprep.mubr.msk.f32.mxu0 %vm8699_vm2, %v8700_v24 }
 0x905   :  { %8424 = vmatprep.subr.bf16.mxu0 %v8698_v23  ;;  %8411 = vmatpush3.bf16.msra.mxu1 %v8410_v39  ;;  %v8476_v39 = vpack.c.bf16 %v4425_v38, %v4424_v37 }
 0x906   :  { %8412 = vmatprep.subr.bf16.mxu1 %v8698_v23  ;;  %7495 = vmatprep.mubr.msk.f32.mxu1 %vm8699_vm2, %v8700_v24 }
 0x908   :  { %8426 = vmatpush3.bf16.msra.mxu0 %v9501_v33 }
 0x909   :  { %8433 = vmatprep.subr.bf16.mxu0 %v8698_v23  ;;  %8414 = vmatpush3.bf16.msra.mxu1 %v8413_v41 }
 0x90a   :  { %8415 = vmatprep.subr.bf16.mxu1 %v8698_v23 }
 0x90b   :  { %7518 = vmatmul.mubr.msk.f32.vlgmr.msra.gmra.mrb[62].mxu0 %vm3364_vm3, %v3742_v43 }
 0x90c   :  { %8435 = vmatpush3.bf16.msra.mxu0 %v9499_v32  ;;  %7539 = vmatprep.mubr.msk.f32.mxu0 %vm8699_vm2, %v8700_v24 }
 0x90d   :  { %8436 = vmatprep.subr.bf16.mxu0 %v8698_v23 }
 0x910   :  { %8438 = vmatpush3.bf16.msra.mxu0 %v9501_v33 }
 0x911   :  { %8445 = vmatprep.subr.bf16.mxu0 %v8698_v23 }
 0x913   :  { %7540 = vmatmul.mubr.msk.f32.vlgmr.msra.gmra.mrb[64].mxu0 %vm3364_vm3, %v3894_v4  ;;  %v8479_v4 = vpack.c.bf16 %v4427_v3, %v4426_v40  ;;  %v5641_v40 = vld [vmem:[%s9950_s7 + $0x1c8] sm:$0xff] }
 0x914   :  { %8447 = vmatpush3.bf16.msra.mxu0 %v9499_v32  ;;  %7561 = vmatprep.mubr.msk.f32.mxu0 %vm8699_vm2, %v8700_v24 }
 0x915   :  { %8448 = vmatprep.subr.bf16.mxu0 %v8698_v23 }
 0x918   :  { %8450 = vmatpush3.bf16.msra.mxu0 %v9501_v33 }
 0x919   :  { %8457 = vmatprep.subr.bf16.mxu0 %v8698_v23 }
 0x91b   :  { %7562 = vmatmul.mubr.msk.f32.vlgmr.msra.gmra.mrb[66].mxu0 %vm3364_vm3, %v4046_v44  ;;  %v4576_v44 = vld [vmem:[%s9950_s7 + $0xe0] sm:$0xff] }
 0x91c   :  { %8459 = vmatpush3.bf16.msra.mxu0 %v9499_v32  ;;  %7583 = vmatprep.mubr.msk.f32.mxu0 %vm8699_vm2, %v8700_v24 }
 0x91d   :  { %8460 = vmatprep.subr.bf16.mxu0 %v8698_v23 }
 0x920   :  { %8462 = vmatpush3.bf16.msra.mxu0 %v9501_v33 }
 0x921   :  { %8469 = vmatprep.subr.bf16.mxu0 %v8698_v23 }
 0x923   :  { %7584 = vmatmul.mubr.msk.f32.vlgmr.msra.gmra.mrb[68].mxu0 %vm3364_vm3, %v4198_v45  ;;  %v4577_v45 = vld [vmem:[%s9950_s7 + $0xe8] sm:$0xff] }
 0x924   :  { %8471 = vmatpush3.bf16.msra.mxu0 %v9499_v32  ;;  %7605 = vmatprep.mubr.msk.f32.mxu0 %vm8699_vm2, %v8700_v24 }
 0x925   :  { %8472 = vmatprep.subr.bf16.mxu0 %v8698_v23 }
 0x928   :  { %8474 = vmatpush3.bf16.msra.mxu0 %v9501_v33 }
 0x929   :  { %8481 = vmatprep.subr.bf16.mxu0 %v8698_v23 }
 0x92b   :  { %7606 = vmatmul.mubr.msk.f32.vlgmr.msra.gmra.mrb[70].mxu0 %vm3364_vm3, %v4350_v46  ;;  %v8488_v46 = vpack.c.bf16 %v4577_v45, %v4576_v44 }
 0x92c   :  { %8483 = vmatpush3.bf16.msra.mxu0 %v9499_v32  ;;  %7627 = vmatprep.mubr.msk.f32.mxu0 %vm8699_vm2, %v8700_v24 }
 0x92d   :  { %8484 = vmatprep.subr.bf16.mxu0 %v8698_v23 }
 0x930   :  { %8486 = vmatpush3.bf16.msra.mxu0 %v9501_v33 }
 0x931   :  { %8493 = vmatprep.subr.bf16.mxu0 %v8698_v23 }
 0x933   :  { %7628 = vmatmul.mubr.msk.f32.vlgmr.msra.gmra.mrb[72].mxu0 %vm3364_vm3, %v4502_v47  ;;  %v4578_v47 = vld [vmem:[%s9950_s7 + $0xf0] sm:$0xff] }
 0x934   :  { %8495 = vmatpush3.bf16.msra.mxu0 %v9499_v32  ;;  %7649 = vmatprep.mubr.msk.f32.mxu0 %vm8699_vm2, %v8700_v24 }
 0x935   :  { %8496 = vmatprep.subr.bf16.mxu0 %v8698_v23 }
 0x938   :  { %8498 = vmatpush3.bf16.msra.mxu0 %v9501_v33 }
 0x939   :  { %8505 = vmatprep.subr.bf16.mxu0 %v8698_v23 }
 0x93b   :  { %7650 = vmatmul.mubr.msk.f32.vlgmr.msra.gmra.mrb[74].mxu0 %vm3364_vm3, %v4654_v48  ;;  %v4579_v48 = vld [vmem:[%s9950_s7 + $0xf8] sm:$0xff] }
 0x93c   :  { %8507 = vmatpush3.bf16.msra.mxu0 %v9499_v32  ;;  %7671 = vmatprep.mubr.msk.f32.mxu0 %vm8699_vm2, %v8700_v24 }
 0x93d   :  { %8508 = vmatprep.subr.bf16.mxu0 %v8698_v23 }
 0x940   :  { %8510 = vmatpush3.bf16.msra.mxu0 %v9501_v33 }
 0x941   :  { %8517 = vmatprep.subr.bf16.mxu0 %v8698_v23 }
 0x943   :  { %7672 = vmatmul.mubr.msk.f32.vlgmr.msra.gmra.mrb[76].mxu0 %vm3364_vm3, %v4806_v50 }
 0x944   :  { %8519 = vmatpush3.bf16.msra.mxu0 %v9499_v32  ;;  %7693 = vmatprep.mubr.msk.f32.mxu0 %vm8699_vm2, %v8700_v24 }
 0x945   :  { %8520 = vmatprep.subr.bf16.mxu0 %v8698_v23 }
 0x948   :  { %8522 = vmatpush3.bf16.msra.mxu0 %v9501_v33 }
 0x949   :  { %8529 = vmatprep.subr.bf16.mxu0 %v8698_v23 }
 0x94b   :  { %7694 = vmatmul.mubr.msk.f32.vlgmr.msra.gmra.mrb[78].mxu0 %vm3364_vm3, %v4958_v51 }
 0x94c   :  { %8531 = vmatpush3.bf16.msra.mxu0 %v9499_v32  ;;  %7715 = vmatprep.mubr.msk.f32.mxu0 %vm8699_vm2, %v8700_v24 }
 0x94d   :  { %8532 = vmatprep.subr.bf16.mxu0 %v8698_v23 }
 0x950   :  { %8534 = vmatpush3.bf16.msra.mxu0 %v9501_v33 }
 0x951   :  { %8541 = vmatprep.subr.bf16.mxu0 %v8698_v23 }
 0x953   :  { %7716 = vmatmul.mubr.msk.f32.vlgmr.msra.gmra.mrb[80].mxu0 %vm3364_vm3, %v5110_v5  ;;  %v8491_v5 = vpack.c.bf16 %v4579_v48, %v4578_v47  ;;  %v5793_v47 = vld [vmem:[%s9950_s7 + $0x1e8] sm:$0xff] }
 0x954   :  { %8543 = vmatpush3.bf16.msra.mxu0 %v9499_v32  ;;  %7737 = vmatprep.mubr.msk.f32.mxu0 %vm8699_vm2, %v8700_v24 }
 0x955   :  { %8544 = vmatprep.subr.bf16.mxu0 %v8698_v23 }
 0x958   :  { %8546 = vmatpush3.bf16.msra.mxu0 %v9501_v33 }
 0x959   :  { %8553 = vmatprep.subr.bf16.mxu0 %v8698_v23 }
 0x95b   :  { %7738 = vmatmul.mubr.msk.f32.vlgmr.msra.gmra.mrb[82].mxu0 %vm3364_vm3, %v5262_v52  ;;  %v4728_v52 = vld [vmem:[%s9950_s7 + $0x100] sm:$0xff] }
 0x95c   :  { %8555 = vmatpush3.bf16.msra.mxu0 %v9499_v32  ;;  %7759 = vmatprep.mubr.msk.f32.mxu0 %vm8699_vm2, %v8700_v24 }
 0x95d   :  { %8556 = vmatprep.subr.bf16.mxu0 %v8698_v23 }
 0x960   :  { %8558 = vmatpush3.bf16.msra.mxu0 %v9501_v33 }
 0x961   :  { %8565 = vmatprep.subr.bf16.mxu0 %v8698_v23 }
 0x963   :  { %7760 = vmatmul.mubr.msk.f32.vlgmr.msra.gmra.mrb[84].mxu0 %vm3364_vm3, %v5414_v53  ;;  %v4729_v53 = vld [vmem:[%s9950_s7 + $0x108] sm:$0xff] }
 0x964   :  { %8567 = vmatpush3.bf16.msra.mxu0 %v9499_v32  ;;  %7781 = vmatprep.mubr.msk.f32.mxu0 %vm8699_vm2, %v8700_v24 }
 0x965   :  { %8568 = vmatprep.subr.bf16.mxu0 %v8698_v23 }
 0x968   :  { %8570 = vmatpush3.bf16.msra.mxu0 %v9501_v33 }
 0x969   :  { %8577 = vmatprep.subr.bf16.mxu0 %v8698_v23 }
 0x96b   :  { %7782 = vmatmul.mubr.msk.f32.vlgmr.msra.gmra.mrb[86].mxu0 %vm3364_vm3, %v5566_v7  ;;  %v8500_v7 = vpack.c.bf16 %v4729_v53, %v4728_v52 }
 0x96c   :  { %8579 = vmatpush3.bf16.msra.mxu0 %v9499_v32  ;;  %7803 = vmatprep.mubr.msk.f32.mxu0 %vm8699_vm2, %v8700_v24  ;;  %v4275_v32 = vld [vmem:[%s9950_s7 + $0xb8] sm:$0xff] }
 0x96d   :  { %8580 = vmatprep.subr.bf16.mxu0 %v8698_v23  ;;  %v8467_v36 = vpack.c.bf16 %v4275_v32, %v4274_v31  ;;  %v5489_v31 = vld [vmem:[%s9950_s7 + $0x1a8] sm:$0xff] }
 0x970   :  { %8582 = vmatpush3.bf16.msra.mxu0 %v9501_v33 }
 0x973   :  { %7804 = vmatmul.mubr.msk.f32.vlgmr.msra.gmra.mrb[88].mxu0 %vm3364_vm3, %v5718_v54  ;;  %v4730_v54 = vld [vmem:[%s9950_s7 + $0x110] sm:$0xff] }
 0x974   :  { %v8503_v59 = vpack.c.bf16 %v4731_v55, %v4730_v54 }
 0x9d6   :  { %v3588_v61 = vpop.f32.mrb[60].mxu0  ;;  %v3510_v62 = vpop.f32.mrb[28].mxu1 }
 0x9d7   :  { %v7486_v0 = vpop.f32.mrb[61].mxu0  ;;  %7496 = vmatmul.mubr.msk.f32.vlgmr.msra.gmra.mrb[30].mxu1 %vm3364_vm3, %v3588_v61  ;;  %v7475_v1 = vpop.f32.mrb[29].mxu1  ;;  %v4881_v61 = vld [vmem:[%s9950_s7 + $0x128] sm:$0xff] }
 0x9d8   :  { %8417 = vmatpush3.bf16.msra.mxu1 %v8416_v58  ;;  %7506 = vmatprep.mubr.msk.f32.mxu1 %vm8699_vm2, %v8700_v24  ;;  %v4882_v0 = vld [vmem:[%s9950_s7 + $0x130] sm:$0xff]  ;;  %v4883_v1 = vld [vmem:[%s9950_s7 + $0x138] sm:$0xff] }
 0x9d9   :  { %8418 = vmatprep.subr.bf16.mxu1 %v8698_v23  ;;  %v8515_v9 = vpack.c.bf16 %v4883_v1, %v4882_v0 }
 0x9dc   :  { %8420 = vmatpush3.bf16.msra.mxu1 %v8419_v2 }
 0x9dd   :  { %8427 = vmatprep.subr.bf16.mxu1 %v8698_v23 }
 0x9de   :  { %v3812_v28 = vpop.f32.mrb[62].mxu0 }
 0x9df   :  { %7507 = vmatmul.mubr.msk.f32.vlgmr.msra.gmra.mrb[30].mxu1 %vm3364_vm3, %v3510_v62  ;;  %v7519_v35 = vpop.f32.mrb[63].mxu0  ;;  %v8512_v62 = vpack.c.bf16 %v4881_v61, %v4880_v60 }
 0x9e0   :  { %8429 = vmatpush3.bf16.msra.mxu1 %v8428_v10  ;;  %7528 = vmatprep.mubr.msk.f32.mxu1 %vm8699_vm2, %v8700_v24  ;;  %v5032_v10 = vld [vmem:[%s9950_s7 + $0x140] sm:$0xff]  ;;  %v5035_v35 = vld [vmem:[%s9950_s7 + $0x158] sm:$0xff] }
 0x9e1   :  { %8430 = vmatprep.subr.bf16.mxu1 %v8698_v23  ;;  %v8524_v12 = vpack.c.bf16 %v5033_v11, %v5032_v10 }
 0x9e4   :  { %8432 = vmatpush3.bf16.msra.mxu1 %v8431_v42 }
 0x9e5   :  { %8439 = vmatprep.subr.bf16.mxu1 %v8698_v23 }
 0x9e6   :  { %v3964_v13 = vpop.f32.mrb[64].mxu0 }
 0x9e7   :  { %7529 = vmatmul.mubr.msk.f32.vlgmr.msra.gmra.mrb[30].mxu1 %vm3364_vm3, %v3812_v28  ;;  %v7541_v14 = vpop.f32.mrb[65].mxu0  ;;  %v5034_v28 = vld [vmem:[%s9950_s7 + $0x150] sm:$0xff] }
 0x9e8   :  { %8441 = vmatpush3.bf16.msra.mxu1 %v8440_v63  ;;  %7550 = vmatprep.mubr.msk.f32.mxu1 %vm8699_vm2, %v8700_v24  ;;  %v8527_v56 = vpack.c.bf16 %v5035_v35, %v5034_v28  ;;  %v5184_v63 = vld [vmem:[%s9950_s7 + $0x160] sm:$0xff]  ;;  %v5187_v14 = vld [vmem:[%s9950_s7 + $0x178] sm:$0xff] }
 0x9e9   :  { %8442 = vmatprep.subr.bf16.mxu1 %v8698_v23  ;;  %v8536_v16 = vpack.c.bf16 %v5185_v6, %v5184_v63  ;;  %v6074_v63 = vld [vmem:[%s9953_s9] ss:$0 sm:$0xff] }
 0x9ec   :  { %8444 = vmatpush3.bf16.msra.mxu1 %v8443_v15 }
 0x9ed   :  { %8451 = vmatprep.subr.bf16.mxu1 %v8698_v23 }
 0x9ee   :  { %v4116_v22 = vpop.f32.mrb[66].mxu0 }
 0x9ef   :  { %7551 = vmatmul.mubr.msk.f32.vlgmr.msra.gmra.mrb[30].mxu1 %vm3364_vm3, %v3964_v13  ;;  %v7563_v25 = vpop.f32.mrb[67].mxu0  ;;  %v5186_v13 = vld [vmem:[%s9950_s7 + $0x170] sm:$0xff] }
 0x9f0   :  { %8453 = vmatpush3.bf16.msra.mxu1 %v8452_v19  ;;  %7572 = vmatprep.mubr.msk.f32.mxu1 %vm8699_vm2, %v8700_v24  ;;  %v8539_v18 = vpack.c.bf16 %v5187_v14, %v5186_v13  ;;  %v5336_v19 = vld [vmem:[%s9950_s7 + $0x180] sm:$0xff]  ;;  %v5339_v25 = vld [vmem:[%s9950_s7 + $0x198] sm:$0xff] }
 0x9f1   :  { %8454 = vmatprep.subr.bf16.mxu1 %v8698_v23  ;;  %v8548_v21 = vpack.c.bf16 %v5337_v20, %v5336_v19  ;;  %v5912_v14 = vld [vmem:[%s9954_s10] sm:$0xff] }
 0x9f4   :  { %8456 = vmatpush3.bf16.msra.mxu1 %v8455_v26 }
 0x9f5   :  { %8463 = vmatprep.subr.bf16.mxu1 %v8698_v23 }
 0x9f6   :  { %v4268_v33 = vpop.f32.mrb[68].mxu0 }
 0x9f7   :  { %7573 = vmatmul.mubr.msk.f32.vlgmr.msra.gmra.mrb[30].mxu1 %vm3364_vm3, %v4116_v22  ;;  %v7585_v34 = vpop.f32.mrb[69].mxu0  ;;  %v5338_v22 = vld [vmem:[%s9950_s7 + $0x190] sm:$0xff] }
 0x9f8   :  { %8465 = vmatpush3.bf16.msra.mxu1 %v8464_v30  ;;  %7594 = vmatprep.mubr.msk.f32.mxu1 %vm8699_vm2, %v8700_v24  ;;  %v8551_v29 = vpack.c.bf16 %v5339_v25, %v5338_v22  ;;  %v5488_v30 = vld [vmem:[%s9950_s7 + $0x1a0] sm:$0xff]  ;;  %v5491_v34 = vld [vmem:[%s9950_s7 + $0x1b8] sm:$0xff] }
 0x9f9   :  { %8466 = vmatprep.subr.bf16.mxu1 %v8698_v23  ;;  %v8560_v32 = vpack.c.bf16 %v5489_v31, %v5488_v30 }
 0x9fc   :  { %8468 = vmatpush3.bf16.msra.mxu1 %v8467_v36 }
 0x9fd   :  { %8475 = vmatprep.subr.bf16.mxu1 %v8698_v23 }
 0x9fe   :  { %v4420_v41 = vpop.f32.mrb[70].mxu0 }
 0x9ff   :  { %7595 = vmatmul.mubr.msk.f32.vlgmr.msra.gmra.mrb[30].mxu1 %vm3364_vm3, %v4268_v33  ;;  %v7607_v43 = vpop.f32.mrb[71].mxu0  ;;  %v5490_v33 = vld [vmem:[%s9950_s7 + $0x1b0] sm:$0xff] }
 0xa00   :  { %8477 = vmatpush3.bf16.msra.mxu1 %v8476_v39  ;;  %7616 = vmatprep.mubr.msk.f32.mxu1 %vm8699_vm2, %v8700_v24  ;;  %v8563_v38 = vpack.c.bf16 %v5491_v34, %v5490_v33  ;;  %v5640_v39 = vld [vmem:[%s9950_s7 + $0x1c0] sm:$0xff]  ;;  %v5643_v43 = vld [vmem:[%s9950_s7 + $0x1d8] sm:$0xff] }
 0xa01   :  { %8478 = vmatprep.subr.bf16.mxu1 %v8698_v23  ;;  %v8572_v3 = vpack.c.bf16 %v5641_v40, %v5640_v39 }
 0xa04   :  { %8480 = vmatpush3.bf16.msra.mxu1 %v8479_v4 }
 0xa05   :  { %8487 = vmatprep.subr.bf16.mxu1 %v8698_v23 }
 0xa06   :  { %v4572_v50 = vpop.f32.mrb[72].mxu0 }
 0xa07   :  { %7617 = vmatmul.mubr.msk.f32.vlgmr.msra.gmra.mrb[30].mxu1 %vm3364_vm3, %v4420_v41  ;;  %v7629_v51 = vpop.f32.mrb[73].mxu0  ;;  %v5642_v41 = vld [vmem:[%s9950_s7 + $0x1d0] sm:$0xff] }
 0xa08   :  { %8489 = vmatpush3.bf16.msra.mxu1 %v8488_v46  ;;  %7638 = vmatprep.mubr.msk.f32.mxu1 %vm8699_vm2, %v8700_v24  ;;  %v8575_v45 = vpack.c.bf16 %v5643_v43, %v5642_v41  ;;  %v5792_v46 = vld [vmem:[%s9950_s7 + $0x1e0] sm:$0xff]  ;;  %v5795_v51 = vld [vmem:[%s9950_s7 + $0x1f8] sm:$0xff] }
 0xa09   :  { %8490 = vmatprep.subr.bf16.mxu1 %v8698_v23  ;;  %v8584_v48 = vpack.c.bf16 %v5793_v47, %v5792_v46 }
 0xa0c   :  { %8492 = vmatpush3.bf16.msra.mxu1 %v8491_v5 }
 0xa0d   :  { %8499 = vmatprep.subr.bf16.mxu1 %v8698_v23 }
 0xa0e   :  { %v4724_v57 = vpop.f32.mrb[74].mxu0 }
 0xa0f   :  { %7639 = vmatmul.mubr.msk.f32.vlgmr.msra.gmra.mrb[30].mxu1 %vm3364_vm3, %v4572_v50  ;;  %v7651_v58 = vpop.f32.mrb[75].mxu0  ;;  %v5794_v50 = vld [vmem:[%s9950_s7 + $0x1f0] sm:$0xff] }
 0xa10   :  { %8501 = vmatpush3.bf16.msra.mxu1 %v8500_v7  ;;  %7660 = vmatprep.mubr.msk.f32.mxu1 %vm8699_vm2, %v8700_v24  ;;  %v8587_v53 = vpack.c.bf16 %v5795_v51, %v5794_v50 }
 0xa11   :  { %8502 = vmatprep.subr.bf16.mxu1 %v8698_v23 }
 0xa14   :  { %8504 = vmatpush3.bf16.msra.mxu1 %v8503_v59 }
 0xa15   :  { %8511 = vmatprep.subr.bf16.mxu1 %v8698_v23 }
 0xa16   :  { %v4876_v2 = vpop.f32.mrb[76].mxu0 }
 0xa17   :  { %7661 = vmatmul.mubr.msk.f32.vlgmr.msra.gmra.mrb[30].mxu1 %vm3364_vm3, %v4724_v57  ;;  %v7673_v8 = vpop.f32.mrb[77].mxu0 }
 0xa18   :  { %8513 = vmatpush3.bf16.msra.mxu1 %v8512_v62  ;;  %7682 = vmatprep.mubr.msk.f32.mxu1 %vm8699_vm2, %v8700_v24 }
 0xa19   :  { %8514 = vmatprep.subr.bf16.mxu1 %v8698_v23 }
 0xa1c   :  { %8516 = vmatpush3.bf16.msra.mxu1 %v8515_v9 }
 0xa1d   :  { %8523 = vmatprep.subr.bf16.mxu1 %v8698_v23 }
 0xa1e   :  { %v5028_v42 = vpop.f32.mrb[78].mxu0 }
 0xa1f   :  { %7683 = vmatmul.mubr.msk.f32.vlgmr.msra.gmra.mrb[30].mxu1 %vm3364_vm3, %v4876_v2  ;;  %v7695_v49 = vpop.f32.mrb[79].mxu0 }
 0xa20   :  { %8525 = vmatpush3.bf16.msra.mxu1 %v8524_v12  ;;  %7704 = vmatprep.mubr.msk.f32.mxu1 %vm8699_vm2, %v8700_v24  ;;  %v6073_v49 = vld [vmem:[%s9952_s8] ss:$0 sm:$0xff] }
 0xa21   :  { %8526 = vmatprep.subr.bf16.mxu1 %v8698_v23 }
 0xa24   :  { %8528 = vmatpush3.bf16.msra.mxu1 %v8527_v56 }
 0xa25   :  { %8535 = vmatprep.subr.bf16.mxu1 %v8698_v23 }
 0xa26   :  { %v5180_v15 = vpop.f32.mrb[80].mxu0 }
 0xa27   :  { %7705 = vmatmul.mubr.msk.f32.vlgmr.msra.gmra.mrb[30].mxu1 %vm3364_vm3, %v5028_v42  ;;  %v7717_v17 = vpop.f32.mrb[81].mxu0 }
 0xa28   :  { %8537 = vmatpush3.bf16.msra.mxu1 %v8536_v16  ;;  %7726 = vmatprep.mubr.msk.f32.mxu1 %vm8699_vm2, %v8700_v24 }
 0xa29   :  { %8538 = vmatprep.subr.bf16.mxu1 %v8698_v23 }
 0xa2c   :  { %8540 = vmatpush3.bf16.msra.mxu1 %v8539_v18 }
 0xa2d   :  { %8547 = vmatprep.subr.bf16.mxu1 %v8698_v23 }
 0xa2e   :  { %v5332_v26 = vpop.f32.mrb[82].mxu0 }
 0xa2f   :  { %7727 = vmatmul.mubr.msk.f32.vlgmr.msra.gmra.mrb[30].mxu1 %vm3364_vm3, %v5180_v15  ;;  %v7739_v27 = vpop.f32.mrb[83].mxu0 }
 0xa30   :  { %8549 = vmatpush3.bf16.msra.mxu1 %v8548_v21  ;;  %7748 = vmatprep.mubr.msk.f32.mxu1 %vm8699_vm2, %v8700_v24 }
 0xa31   :  { %8550 = vmatprep.subr.bf16.mxu1 %v8698_v23 }
 0xa34   :  { %8552 = vmatpush3.bf16.msra.mxu1 %v8551_v29 }
 0xa35   :  { %8559 = vmatprep.subr.bf16.mxu1 %v8698_v23 }
 0xa36   :  { %v5484_v36 = vpop.f32.mrb[84].mxu0 }
 0xa37   :  { %7749 = vmatmul.mubr.msk.f32.vlgmr.msra.gmra.mrb[30].mxu1 %vm3364_vm3, %v5332_v26  ;;  %v7761_v37 = vpop.f32.mrb[85].mxu0 }
 0xa38   :  { %8561 = vmatpush3.bf16.msra.mxu1 %v8560_v32  ;;  %7770 = vmatprep.mubr.msk.f32.mxu1 %vm8699_vm2, %v8700_v24 }
 0xa39   :  { %8562 = vmatprep.subr.bf16.mxu1 %v8698_v23 }
 0xa3c   :  { %8564 = vmatpush3.bf16.msra.mxu1 %v8563_v38 }
 0xa3d   :  { %8571 = vmatprep.subr.bf16.mxu1 %v8698_v23 }
 0xa3e   :  { %v5636_v4 = vpop.f32.mrb[86].mxu0 }
 0xa3f   :  { %7771 = vmatmul.mubr.msk.f32.vlgmr.msra.gmra.mrb[30].mxu1 %vm3364_vm3, %v5484_v36  ;;  %v7783_v44 = vpop.f32.mrb[87].mxu0 }
 0xa40   :  { %8573 = vmatpush3.bf16.msra.mxu1 %v8572_v3  ;;  %7792 = vmatprep.mubr.msk.f32.mxu1 %vm8699_vm2, %v8700_v24 }
 0xa41   :  { %8574 = vmatprep.subr.bf16.mxu1 %v8698_v23 }
 0xa44   :  { %8576 = vmatpush3.bf16.msra.mxu1 %v8575_v45 }
 0xa45   :  { %8583 = vmatprep.subr.bf16.mxu1 %v8698_v23 }
 0xa46   :  { %v5788_v5 = vpop.f32.mrb[88].mxu0 }
 0xa47   :  { %7793 = vmatmul.mubr.msk.f32.vlgmr.msra.gmra.mrb[30].mxu1 %vm3364_vm3, %v5636_v4  ;;  %v7805_v52 = vpop.f32.mrb[89].mxu0 }
 0xa48   :  { %8585 = vmatpush3.bf16.msra.mxu1 %v8584_v48  ;;  %7814 = vmatprep.mubr.msk.f32.mxu1 %vm8699_vm2, %v8700_v24 }
 0xa49   :  { %8586 = vmatprep.subr.bf16.mxu1 %v8698_v23 }
 0xa4c   :  { %8588 = vmatpush3.bf16.msra.mxu1 %v8587_v53 }
 0xa4f   :  { %7815 = vmatmul.mubr.msk.f32.vlgmr.msra.gmra.mrb[30].mxu1 %vm3364_vm3, %v5788_v5 }
 0xb22   :  { %v5865_v7 = vpop.f32.mrb[30].mxu1 }
 0xb23   :  { %v5873_v54 = vsel %vm5872_vm7, %v5865_v7, 0.0  ;;  %v7816_v55 = vpop.f32.mrb[31].mxu1 }
 0xb24   :  { %v5874_v57 = vrot.slane %v5873_v54, 4 }
 0xb26   :  { %v5875_v58 = vadd.f32 %v5874_v57, %v5873_v54 }
 0xb28   :  { %v5876_v59 = vrot.slane %v5875_v58, 2 }
 0xb2a   :  { %v5877_v60 = vadd.f32 %v5876_v59, %v5875_v58 }
 0xb2c   :  { %v5878_v61 = vrot.slane %v5877_v60, 1 }
 0xb2e   :  { %v5879_v62 = vadd.f32 %v5878_v61, %v5877_v60 }
 0xb30   :  { %v5881_v0 = vmul.f32 0.125, %v5879_v62 }
 0xb32   :  { %v5882_v1 = vsub.f32 %v5865_v7, %v5881_v0 }
 0xb34   :  { %v5883_v2 = vmul.f32 %v5882_v1, %v5882_v1 }
 0xb36   :  { %v5884_v8 = vsel %vm5872_vm7, %v5883_v2, 0.0 }
 0xb37   :  { %v5885_v24 = vrot.slane %v5884_v8, 4 }
 0xb39   :  { %v5886_v9 = vadd.f32 %v5885_v24, %v5884_v8 }
 0xb3b   :  { %v5887_v23 = vrot.slane %v5886_v9, 2 }
 0xb3d   :  { %v5888_v10 = vadd.f32 %v5887_v23, %v5886_v9 }
 0xb3f   :  { %v5889_v11 = vrot.slane %v5888_v10, 1 }
 0xb41   :  { %v5890_v12 = vadd.f32 %v5889_v11, %v5888_v10 }
 0xb43   :  { %v5891_v28 = vmul.f32 0.125, %v5890_v12 }
 0xb45   :  { %v5892_v35 = vadd.f32 1e-05, %v5891_v28 }
 0xb47   :  { %8688 = vrsqrt.f32 %v5892_v35 }
 0xb51   :  { %v8689_v42 = vpop.eup %8688 }
 0xb52   :  { %v5894_v56 = vmul.f32 %v8689_v42, %v5882_v1 }
 0xb54   :  { %v5901_v6 = vmul.f32 %v6073_v49, %v5894_v56 }
 0xb56   :  { %v5908_v16 = vadd.f32 %v6074_v63, %v5901_v6 }
 0xb58   :  { %vm5909_vm8 = vcmp.gt.f32.partialorder %v5908_v16, 0.0  ;;  %v5910_v13 = vmul.f32 0.2, %v5908_v16 }
 0xb5a   :  { %v5911_v15 = vsel %vm5909_vm8, %v5908_v16, %v5910_v13 }
 0xb5b   :  { %v5913_v17 = vmul.f32 %v5912_v14, %v5911_v15 }
 0xb5d   :  { %v5915_v18 = vsel %vm5914_vm9, %v5913_v17, 0.0  ;;  %v5935_v19 = vrot.slane %v5913_v17, 4 }
 0xb5e   :  { %5916 = vadd.xlane.f32.xlu0 %v5915_v18 }
 0xb5f   :  { %v5937_v20 = vsel %vm5914_vm9, %v5935_v19, 0.0 }
 0xb62   :  { %5938 = vadd.xlane.f32.xlu0 %v5937_v20 }
 0xbeb   :  { %v5917_v21 = vpop.xlane.xlu0 %5916 }
 0xbec   :  { %v5918_v22 = vrot.slane %v5917_v21, 4 }
 0xbee   :  { %v5919_v25 = vadd.f32 %v5918_v22, %v5917_v21 }
 0xbef   :  { %v5939_v26 = vpop.xlane.xlu0 %5938 }
 0xbf0   :  { %v5920_v27 = vrot.slane %v5919_v25, 2  ;;  %v5940_v29 = vrot.slane %v5939_v26, 4 }
 0xbf2   :  { %v5941_v30 = vadd.f32 %v5940_v29, %v5939_v26  ;;  %v5921_v31 = vadd.f32 %v5920_v27, %v5919_v25 }
 0xbf4   :  { %v5942_v32 = vrot.slane %v5941_v30, 2  ;;  %v5922_v33 = vrot.slane %v5921_v31, 1 }
 0xbf6   :  { %v5943_v34 = vadd.f32 %v5942_v32, %v5941_v30  ;;  %v5923_v36 = vadd.f32 %v5922_v33, %v5921_v31 }
 0xbf8   :  { %8679 = vpush %v5923_v36  ;;  %v5944_v37 = vrot.slane %v5943_v34, 1 }
 0xbfa   :  { %v5945_v38 = vadd.f32 %v5944_v37, %v5943_v34 }
 0xbfc   :  { %8681 = vpush %v5945_v38 }
 0xc29   :  { %s8680_s8 = spop %8679 }
 0xc2a   :  { %v5925_v39 = vstv %s8680_s8 }
 0xc2b   :  { %v5926_v40 = vsub.f32 0.0, %v5925_v39 }
 0xc2d   :  { %v5927_v3 = vmul.f32 1.442695, %v5926_v40  ;;  %s8682_s9 = spop %8681 }
 0xc2e   :  { %v5947_v41 = vstv %s8682_s9 }
 0xc2f   :  { %8690 = vpow2.f32 %v5927_v3  ;;  %v5948_v43 = vsub.f32 0.0, %v5947_v41 }
 0xc31   :  { %v5949_v4 = vmul.f32 1.442695, %v5948_v43 }
 0xc33   :  { %8692 = vpow2.f32 %v5949_v4 }
 0xc39   :  { %v8691_v44 = vpop.eup %8690 }
 0xc3a   :  { %v5929_v45 = vadd.f32 1.0, %v8691_v44 }
 0xc3c   :  { %8694 = vrcp.f32 %v5929_v45 }
 0xc3d   :  { %v8693_v46 = vpop.eup %8692 }
 0xc3e   :  { %v5951_v47 = vadd.f32 1.0, %v8693_v46 }
 0xc40   :  { %8696 = vrcp.f32 %v5951_v47 }
 0xc46   :  { %v8695_v48 = vpop.eup %8694 }
 0xc47   :  { %5933 = vst.msk [vmem:[%s9955_s11] sm:$0x1] %vm5932_vm10, %v8695_v48 }
 0xc4a   :  { %v8697_v50 = vpop.eup %8696 }
 0xc4b   :  { %5954 = vst.msk [vmem:[%s9955_s11 + $0x1] sm:$0x1] %vm5932_vm10, %v8697_v50 }

</bundles_post_ra>
